<compile_context>
chip_gen: v6e
topology: v6e:2x2x1
jax: 0.10.0
libtpu: 0.0.40
codegen_flags: <defaults>
</compile_context>

<pallas_src>
import functools

import jax
import jax.numpy as jnp
from jax import lax
from jax.experimental import pallas as pl
from jax.experimental.pallas import tpu as pltpu

LSTM_HIDDEN = 64
SEQ_FC_OUT = 32
STATIC_H1 = 64
STATIC_H2 = 32
FINAL_H = 32


# ----------------------------------------------------------------------------
# Kernel
# ----------------------------------------------------------------------------
def hybrid_kernel(x_seq_ref, x_static_ref,
                  w_ih_ref, b_lstm_ref, w_hh_ref,
                  w_seq_ref, b_seq_ref,
                  w_s1_ref, b_s1_ref,
                  w_s2_ref, b_s2_ref,
                  w_f1s_ref, w_f1t_ref, b_f1_ref,
                  out_ref,
                  xg_sc, h_sc, c_sc,
                  *, t_true, t_block):
    H = LSTM_HIDDEN
    TB, B, F = x_seq_ref.shape            # time-block, batch tile, seq features
    t_idx = pl.program_id(1)
    n_t = pl.num_programs(1)

    # ---- init recurrent state on the first time block of each batch tile ----
    @pl.when(t_idx == 0)
    def _():
        h_sc[...] = jnp.zeros_like(h_sc)
        c_sc[...] = jnp.zeros_like(c_sc)

    # ---- LSTM input projection for this time block: ONE MXU matmul ---------
    # gates(x) = x @ W_ih + (b_ih + b_hh), gate order (i, f, o, g)
    xs = x_seq_ref[...].reshape(TB * B, F)
    xg = jnp.dot(xs, w_ih_ref[...],
                 preferred_element_type=jnp.float32) + b_lstm_ref[...]
    xg_sc[...] = xg.reshape(TB, B, 4 * H)

    w_hh = w_hh_ref[...]                   # (H, 4H), resident across the loop
    needs_mask = (t_true % t_block) != 0   # only the (zero-)padded tail needs it

    # ---- serial recurrence: gates = xg[t] + h @ W_hh ------------------------
    def lstm_step(t, carry):
        h, c = carry
        gates = xg_sc[t] + jnp.dot(h, w_hh, preferred_element_type=jnp.float32)
        sig = jax.nn.sigmoid(gates[:, :3 * H])          # i, f, o in one EUP shot
        g = jnp.tanh(gates[:, 3 * H:])                  # g
        i = sig[:, 0:H]
        f = sig[:, H:2 * H]
        o = sig[:, 2 * H:3 * H]
        c_new = f * c + i * g
        h_new = o * jnp.tanh(c_new)
        if needs_mask:
            valid = (t_idx * t_block + t) < t_true      # skip padded time steps
            c_new = jnp.where(valid, c_new, c)
            h_new = jnp.where(valid, h_new, h)
        return (h_new, c_new)

    unroll = True if TB <= 32 else 8
    h, c = lax.fori_loop(0, TB, lstm_step, (h_sc[...], c_sc[...]), unroll=unroll)
    h_sc[...] = h
    c_sc[...] = c

    # ---- heads: run once, on the last time block ----------------------------
    @pl.when(t_idx == n_t - 1)
    def _():
        h_last = h_sc[...]
        # seq branch: Linear(H, 32) + ReLU          (dropout = identity)
        seq_out = jnp.maximum(
            jnp.dot(h_last, w_seq_ref[...], preferred_element_type=jnp.float32)
            + b_seq_ref[...], 0.0)
        # static branch: Linear(S, 64)+ReLU, Linear(64, 32)+ReLU
        s1 = jnp.maximum(
            jnp.dot(x_static_ref[...], w_s1_ref[...],
                    preferred_element_type=jnp.float32) + b_s1_ref[...], 0.0)
        s2 = jnp.maximum(
            jnp.dot(s1, w_s2_ref[...],
                    preferred_element_type=jnp.float32) + b_s2_ref[...], 0.0)
        # final Linear(64, 32) on concat([seq_out, s2]) done as split matmuls
        pre = (jnp.dot(seq_out, w_f1s_ref[...], preferred_element_type=jnp.float32)
               + jnp.dot(s2, w_f1t_ref[...], preferred_element_type=jnp.float32)
               + b_f1_ref[...])
        out_ref[...] = jnp.maximum(pre, 0.0)            # (B_TILE, 32) lane-dense


# ----------------------------------------------------------------------------
# Tiling (generation-aware)
# ----------------------------------------------------------------------------
def _round_up(x, m):
    return (x + m - 1) // m * m


def _choose_tiles(B, T):
    H = LSTM_HIDDEN
    try:
        vmem_cap = pltpu.get_tpu_info().vmem_capacity_bytes
    except Exception:
        vmem_cap = 64 * 1024 * 1024        # assume the smallest per-TC VMEM (v7x)
    small_vmem = vmem_cap <= 64 * 1024 * 1024
    gates_budget = (4 if small_vmem else 8) * 1024 * 1024
    vmem_limit = (28 if small_vmem else 64) * 1024 * 1024

    # batch tile: multiple of 8, >= 128 whenever the batch allows it
    b_pad = _round_up(B, 8)
    b_tile = min(b_pad, 512 if T <= 32 else 256)
    if b_pad >= 256:
        # keep >= 2 "parallel" grid tiles so both v7x TensorCores get work
        b_tile = min(b_tile, _round_up(-(-b_pad // 2), 8))
    b_tile = max(8, b_tile)
    b_pad = _round_up(b_pad, b_tile)

    # time block: bound the (t_block, b_tile, 4H) f32 gates scratch
    per_step = b_tile * 4 * H * 4
    t_block = int(max(1, min(T, gates_budget // per_step)))
    t_pad = _round_up(T, t_block)
    return b_tile, b_pad, t_block, t_pad, vmem_limit


# ----------------------------------------------------------------------------
# Parameters (synthetic, PyTorch layout: (in, out) matrices, gates (i,f,g,o))
# ----------------------------------------------------------------------------
def init_params(key, static_dim, seq_feature_dim):
    ks = jax.random.split(key, 16)
    H = LSTM_HIDDEN
    sc = 0.1

    def mat(k, shape):
        return (sc * jax.random.normal(k, shape)).astype(jnp.float32)

    return dict(
        w_ih=mat(ks[0], (seq_feature_dim, 4 * H)),
        w_hh=mat(ks[1], (H, 4 * H)),
        b_lstm=(mat(ks[2], (1, 4 * H)) + mat(ks[3], (1, 4 * H))),  # b_ih + b_hh
        w_seq=mat(ks[4], (H, SEQ_FC_OUT)),
        b_seq=mat(ks[5], (1, SEQ_FC_OUT)),
        w_s1=mat(ks[6], (static_dim, STATIC_H1)),
        b_s1=mat(ks[7], (1, STATIC_H1)),
        w_s2=mat(ks[8], (STATIC_H1, STATIC_H2)),
        b_s2=mat(ks[9], (1, STATIC_H2)),
        w_f1=mat(ks[10], (SEQ_FC_OUT + STATIC_H2, FINAL_H)),
        b_f1=mat(ks[11], (1, FINAL_H)),
        w_f2=mat(ks[12], (FINAL_H, 1)),
        b_f2=mat(ks[13], (1, 1)),
    )


# ----------------------------------------------------------------------------
# Forward wrapper
# ----------------------------------------------------------------------------
@functools.partial(jax.jit, static_argnames=("task",))
def hybrid_forward(x_static, x_seq, params, task="regression"):
    """x_static: (B, S) f32, x_seq: (B, T, F) f32 (batch_first, like PyTorch)."""
    x_static = x_static.astype(jnp.float32)
    x_seq = x_seq.astype(jnp.float32)
    B, T, F = x_seq.shape
    S = x_static.shape[1]
    H = LSTM_HIDDEN

    b_tile, b_pad, t_block, t_pad, vmem_limit = _choose_tiles(B, T)

    # Permute gate columns (i, f, g, o) -> (i, f, o, g): one sigmoid + one tanh.
    def permute_gates(w):
        return jnp.concatenate(
            [w[..., :2 * H], w[..., 3 * H:], w[..., 2 * H:3 * H]], axis=-1)

    w_ih = permute_gates(params["w_ih"])          # (F, 4H)
    w_hh = permute_gates(params["w_hh"])          # (H, 4H)
    b_lstm = permute_gates(params["b_lstm"])      # (1, 4H)

    # Time-major, zero-padded inputs (padded time steps are masked in-kernel,
    # padded batch rows are independent and sliced off after the call).
    x_seq_tm = jnp.transpose(x_seq, (1, 0, 2))                     # (T, B, F)
    x_seq_tm = jnp.pad(x_seq_tm, ((0, t_pad - T), (0, b_pad - B), (0, 0)))
    x_static_p = jnp.pad(x_static, ((0, b_pad - B), (0, 0)))

    w_f1 = params["w_f1"]
    args = (x_seq_tm, x_static_p,
            w_ih, b_lstm, w_hh,
            params["w_seq"], params["b_seq"],
            params["w_s1"], params["b_s1"],
            params["w_s2"], params["b_s2"],
            w_f1[:SEQ_FC_OUT],            # rows hitting seq_out
            w_f1[SEQ_FC_OUT:],            # rows hitting static_out
            params["b_f1"])

    grid = (b_pad // b_tile, t_pad // t_block)

    def full_spec(arr):
        n = arr.ndim
        return pl.BlockSpec(arr.shape, lambda b, t, _n=n: (0,) * _n)

    in_specs = [
        pl.BlockSpec((t_block, b_tile, F), lambda b, t: (t, b, 0)),   # x_seq tile
        pl.BlockSpec((b_tile, S), lambda b, t: (b, 0)),               # static tile
    ] + [full_spec(a) for a in args[2:]]                              # weights

    # Advisory cost estimate for XLA's scheduler around the custom call.
    flops = 2 * b_pad * (t_pad * 4 * H * (F + H)
                         + H * SEQ_FC_OUT + S * STATIC_H1
                         + STATIC_H1 * STATIC_H2
                         + (SEQ_FC_OUT + STATIC_H2) * FINAL_H)
    transc = b_pad * t_pad * 5 * H
    bytes_acc = 4 * (x_seq_tm.size + x_static_p.size + b_pad * FINAL_H
                     + sum(int(a.size) for a in args[2:]))
    cost = pl.CostEstimate(flops=flops, transcendentals=transc,
                           bytes_accessed=bytes_acc)

    kernel = functools.partial(hybrid_kernel, t_true=T, t_block=t_block)

    f1 = pl.pallas_call(
        kernel,
        out_shape=jax.ShapeDtypeStruct((b_pad, FINAL_H), jnp.float32),
        grid=grid,
        in_specs=in_specs,
        out_specs=pl.BlockSpec((b_tile, FINAL_H), lambda b, t: (b, 0)),
        scratch_shapes=[
            pltpu.VMEM((t_block, b_tile, 4 * H), jnp.float32),   # gates scratch
            pltpu.VMEM((b_tile, H), jnp.float32),                # h state
            pltpu.VMEM((b_tile, H), jnp.float32),                # c state
        ],
        compiler_params=pltpu.CompilerParams(
            dimension_semantics=("parallel", "arbitrary"),
            vmem_limit_bytes=vmem_limit),
        cost_estimate=cost,
    )(*args)

    # Final 32 -> 1 Linear done here: keeps the kernel output lane-dense and
    # avoids a degenerate N=1 MXU pass / masked partial stores in-kernel.
    out = jnp.dot(f1[:B], params["w_f2"],
                  preferred_element_type=jnp.float32) + params["b_f2"]   # (B, 1)

    if task == "regression":
        return out[:, 0]
    elif task == "classification":
        return jax.nn.sigmoid(out)[:, 0]
    else:
        # TODO(synk): multiclass needs num_classes > 1 in the final Linear; with a
        # single logit, log_softmax is trivially zero.
        return jax.nn.log_softmax(out, axis=1)


# ----------------------------------------------------------------------------
# Pure-JAX reference (PyTorch semantics, eval mode) for a tolerance check
# ----------------------------------------------------------------------------
def reference_forward(x_static, x_seq, params):
    H = LSTM_HIDDEN
    B, T, _ = x_seq.shape
    h = jnp.zeros((B, H), jnp.float32)
    c = jnp.zeros((B, H), jnp.float32)
    for t in range(T):
        gates = x_seq[:, t] @ params["w_ih"] + params["b_lstm"] + h @ params["w_hh"]
        i = jax.nn.sigmoid(gates[:, :H])
        f = jax.nn.sigmoid(gates[:, H:2 * H])
        g = jnp.tanh(gates[:, 2 * H:3 * H])
        o = jax.nn.sigmoid(gates[:, 3 * H:])
        c = f * c + i * g
        h = o * jnp.tanh(c)
    seq_out = jax.nn.relu(h @ params["w_seq"] + params["b_seq"])
    s = jax.nn.relu(x_static @ params["w_s1"] + params["b_s1"])
    s = jax.nn.relu(s @ params["w_s2"] + params["b_s2"])
    x = jnp.concatenate([seq_out, s], axis=1)
    x = jax.nn.relu(x @ params["w_f1"] + params["b_f1"])
    x = x @ params["w_f2"] + params["b_f2"]
    return x[:, 0]


if __name__ == "__main__":
    batch = 2
    seq_len = 8
    seq_feature_dim = 8
    static_dim = 6

    key = jax.random.PRNGKey(0)
    k_params, k_static, k_seq = jax.random.split(key, 3)

    params = init_params(k_params, static_dim, seq_feature_dim)
    x_static = jax.random.normal(k_static, (batch, static_dim), jnp.float32)
    x_seq = jax.random.normal(k_seq, (batch, seq_len, seq_feature_dim), jnp.float32)

    y = hybrid_forward(x_static, x_seq, params, task="regression")
    jax.block_until_ready(y)
    assert y.shape == (batch,)

    y_ref = reference_forward(x_static, x_seq, params)
    assert jnp.allclose(y, y_ref, rtol=2e-2, atol=2e-2), (y, y_ref)

    print("KERNEL_OK")
</pallas_src>

<mosaic_0001>
module attributes {stable_mosaic.version = 11 : i64} {
  func.func @hybrid_kernel(%arg0: i32, %arg1: i32, %arg2: memref<8x8x8xf32, #tpu.memory_space<vmem>>, %arg3: memref<8x6xf32, #tpu.memory_space<vmem>>, %arg4: memref<8x256xf32, #tpu.memory_space<vmem>>, %arg5: memref<1x256xf32, #tpu.memory_space<vmem>>, %arg6: memref<64x256xf32, #tpu.memory_space<vmem>>, %arg7: memref<64x32xf32, #tpu.memory_space<vmem>>, %arg8: memref<1x32xf32, #tpu.memory_space<vmem>>, %arg9: memref<6x64xf32, #tpu.memory_space<vmem>>, %arg10: memref<1x64xf32, #tpu.memory_space<vmem>>, %arg11: memref<64x32xf32, #tpu.memory_space<vmem>>, %arg12: memref<1x32xf32, #tpu.memory_space<vmem>>, %arg13: memref<32x32xf32, #tpu.memory_space<vmem>>, %arg14: memref<32x32xf32, #tpu.memory_space<vmem>>, %arg15: memref<1x32xf32, #tpu.memory_space<vmem>>, %arg16: memref<8x32xf32, #tpu.memory_space<vmem>>, %arg17: memref<8x8x256xf32, #tpu.memory_space<vmem>>, %arg18: memref<8x64xf32, #tpu.memory_space<vmem>>, %arg19: memref<8x64xf32, #tpu.memory_space<vmem>>) attributes {dimension_semantics = [#tpu.dimension_semantics<parallel>, #tpu.dimension_semantics<arbitrary>], iteration_bounds = array<i64: 1, 1>, scalar_prefetch = 0 : i64, scratch_operands = 3 : i64, tpu.core_type = #tpu.core_type<tc>, window_params = [{transform_indices = @transform_0, window_bounds = array<i64: 8, 8, 8>}, {transform_indices = @transform_1, window_bounds = array<i64: 8, 6>}, {pipeline_mode = #tpu.pipeline_mode<synchronous>, transform_indices = @transform_2, window_bounds = array<i64: 8, 256>}, {pipeline_mode = #tpu.pipeline_mode<synchronous>, transform_indices = @transform_3, window_bounds = array<i64: 1, 256>}, {pipeline_mode = #tpu.pipeline_mode<synchronous>, transform_indices = @transform_4, window_bounds = array<i64: 64, 256>}, {pipeline_mode = #tpu.pipeline_mode<synchronous>, transform_indices = @transform_5, window_bounds = array<i64: 64, 32>}, {pipeline_mode = #tpu.pipeline_mode<synchronous>, transform_indices = @transform_6, window_bounds = array<i64: 1, 32>}, {pipeline_mode = #tpu.pipeline_mode<synchronous>, transform_indices = @transform_7, window_bounds = array<i64: 6, 64>}, {pipeline_mode = #tpu.pipeline_mode<synchronous>, transform_indices = @transform_8, window_bounds = array<i64: 1, 64>}, {pipeline_mode = #tpu.pipeline_mode<synchronous>, transform_indices = @transform_9, window_bounds = array<i64: 64, 32>}, {pipeline_mode = #tpu.pipeline_mode<synchronous>, transform_indices = @transform_10, window_bounds = array<i64: 1, 32>}, {pipeline_mode = #tpu.pipeline_mode<synchronous>, transform_indices = @transform_11, window_bounds = array<i64: 32, 32>}, {pipeline_mode = #tpu.pipeline_mode<synchronous>, transform_indices = @transform_12, window_bounds = array<i64: 32, 32>}, {pipeline_mode = #tpu.pipeline_mode<synchronous>, transform_indices = @transform_13, window_bounds = array<i64: 1, 32>}, {transform_indices = @transform_14, window_bounds = array<i64: 8, 32>}]} {
    %c0_i32 = arith.constant 0 : i32
    %0 = arith.cmpi eq, %arg1, %c0_i32 : i32
    %1 = arith.extui %0 : i1 to i32
    %c0_i32_0 = arith.constant 0 : i32
    %2 = arith.cmpi ne, %1, %c0_i32_0 : i32
    scf.if %2 {
      %cst_55 = arith.constant 0.000000e+00 : f32
      %188 = vector.broadcast %cst_55 : f32 to vector<8x64xf32>
      %c0_56 = arith.constant 0 : index
      %c0_57 = arith.constant 0 : index
      %189 = vector.load %arg18[%c0_56, %c0_57] : memref<8x64xf32, #tpu.memory_space<vmem>>, vector<8x64xf32>
      tpu.vector_store %arg18[%c0_56, %c0_57], %188 {strides = array<i32>} : memref<8x64xf32, #tpu.memory_space<vmem>>, vector<8x64xf32>,
      %cst_58 = arith.constant 0.000000e+00 : f32
      %190 = vector.broadcast %cst_58 : f32 to vector<8x64xf32>
      %c0_59 = arith.constant 0 : index
      %c0_60 = arith.constant 0 : index
      %191 = vector.load %arg19[%c0_59, %c0_60] : memref<8x64xf32, #tpu.memory_space<vmem>>, vector<8x64xf32>
      tpu.vector_store %arg19[%c0_59, %c0_60], %190 {strides = array<i32>} : memref<8x64xf32, #tpu.memory_space<vmem>>, vector<8x64xf32>,
    } else {
    }
    %c0 = arith.constant 0 : index
    %c0_1 = arith.constant 0 : index
    %c0_2 = arith.constant 0 : index
    %3 = vector.load %arg2[%c0, %c0_1, %c0_2] : memref<8x8x8xf32, #tpu.memory_space<vmem>>, vector<8x8x8xf32>
    %4 = vector.shape_cast %3 : vector<8x8x8xf32> to vector<64x8xf32>
    %c0_3 = arith.constant 0 : index
    %c0_4 = arith.constant 0 : index
    %5 = vector.load %arg4[%c0_3, %c0_4] : memref<8x256xf32, #tpu.memory_space<vmem>>, vector<8x256xf32>
    %cst = arith.constant dense<0.000000e+00> : vector<64x256xf32>
    %6 = tpu.matmul %4, %5, %cst {dimension_numbers = #tpu.dot_dimension_numbers<[1], [0], [0], [1], [0, 0, 1, 1], [], []>} : vector<64x8xf32>, vector<8x256xf32>, vector<64x256xf32> -> vector<64x256xf32>
    %c0_5 = arith.constant 0 : index
    %c0_6 = arith.constant 0 : index
    %7 = vector.load %arg5[%c0_5, %c0_6] : memref<1x256xf32, #tpu.memory_space<vmem>>, vector<1x256xf32>
    %8 = vector.broadcast %7 : vector<1x256xf32> to vector<64x256xf32>
    %9 = arith.addf %6, %8 : vector<64x256xf32>
    %10 = vector.shape_cast %9 : vector<64x256xf32> to vector<8x8x256xf32>
    %c0_7 = arith.constant 0 : index
    %c0_8 = arith.constant 0 : index
    %c0_9 = arith.constant 0 : index
    %11 = vector.load %arg17[%c0_7, %c0_8, %c0_9] : memref<8x8x256xf32, #tpu.memory_space<vmem>>, vector<8x8x256xf32>
    tpu.vector_store %arg17[%c0_7, %c0_8, %c0_9], %10 {strides = array<i32>} : memref<8x8x256xf32, #tpu.memory_space<vmem>>, vector<8x8x256xf32>,
    %c0_10 = arith.constant 0 : index
    %c0_11 = arith.constant 0 : index
    %12 = vector.load %arg6[%c0_10, %c0_11] : memref<64x256xf32, #tpu.memory_space<vmem>>, vector<64x256xf32>
    %c0_12 = arith.constant 0 : index
    %c0_13 = arith.constant 0 : index
    %13 = vector.load %arg18[%c0_12, %c0_13] : memref<8x64xf32, #tpu.memory_space<vmem>>, vector<8x64xf32>
    %c0_14 = arith.constant 0 : index
    %c0_15 = arith.constant 0 : index
    %14 = vector.load %arg19[%c0_14, %c0_15] : memref<8x64xf32, #tpu.memory_space<vmem>>, vector<8x64xf32>
    %c0_i32_16 = arith.constant 0 : i32
    %15 = arith.index_cast %c0_i32_16 : i32 to index
    %c0_17 = arith.constant 0 : index
    %c0_18 = arith.constant 0 : index
    %16 = vector.load %arg17[%15, %c0_17, %c0_18] : memref<8x8x256xf32, #tpu.memory_space<vmem>>, vector<1x8x256xf32>
    %17 = vector.shape_cast %16 : vector<1x8x256xf32> to vector<8x256xf32>
    %cst_19 = arith.constant dense<0.000000e+00> : vector<8x256xf32>
    %18 = tpu.matmul %13, %12, %cst_19 {dimension_numbers = #tpu.dot_dimension_numbers<[1], [0], [0], [1], [0, 0, 1, 1], [], []>} : vector<8x64xf32>, vector<64x256xf32>, vector<8x256xf32> -> vector<8x256xf32>
    %19 = arith.addf %17, %18 : vector<8x256xf32>
    %20 = vector.extract_strided_slice %19 {offsets = [0, 0], sizes = [8, 192], strides = [1, 1]} : vector<8x256xf32> to vector<8x192xf32>
    %21 = arith.negf %20 : vector<8x192xf32>
    %22 = math.exp %21 : vector<8x192xf32>
    %cst_20 = arith.constant 1.000000e+00 : f32
    %23 = vector.broadcast %cst_20 : f32 to vector<8x192xf32>
    %24 = arith.addf %23, %22 : vector<8x192xf32>
    %25 = arith.divf %23, %24 : vector<8x192xf32>
    %26 = vector.extract_strided_slice %19 {offsets = [0, 192], sizes = [8, 64], strides = [1, 1]} : vector<8x256xf32> to vector<8x64xf32>
    %27 = math.tanh %26 : vector<8x64xf32>
    %28 = vector.extract_strided_slice %25 {offsets = [0, 0], sizes = [8, 64], strides = [1, 1]} : vector<8x192xf32> to vector<8x64xf32>
    %29 = vector.extract_strided_slice %25 {offsets = [0, 64], sizes = [8, 64], strides = [1, 1]} : vector<8x192xf32> to vector<8x64xf32>
    %30 = vector.extract_strided_slice %25 {offsets = [0, 128], sizes = [8, 64], strides = [1, 1]} : vector<8x192xf32> to vector<8x64xf32>
    %31 = arith.mulf %29, %14 : vector<8x64xf32>
    %32 = arith.mulf %28, %27 : vector<8x64xf32>
    %33 = arith.addf %31, %32 : vector<8x64xf32>
    %34 = math.tanh %33 : vector<8x64xf32>
    %35 = arith.mulf %30, %34 : vector<8x64xf32>
    %c1_i32 = arith.constant 1 : i32
    %36 = arith.index_cast %c1_i32 : i32 to index
    %c0_21 = arith.constant 0 : index
    %c0_22 = arith.constant 0 : index
    %37 = vector.load %arg17[%36, %c0_21, %c0_22] : memref<8x8x256xf32, #tpu.memory_space<vmem>>, vector<1x8x256xf32>
    %38 = vector.shape_cast %37 : vector<1x8x256xf32> to vector<8x256xf32>
    %cst_23 = arith.constant dense<0.000000e+00> : vector<8x256xf32>
    %39 = tpu.matmul %35, %12, %cst_23 {dimension_numbers = #tpu.dot_dimension_numbers<[1], [0], [0], [1], [0, 0, 1, 1], [], []>} : vector<8x64xf32>, vector<64x256xf32>, vector<8x256xf32> -> vector<8x256xf32>
    %40 = arith.addf %38, %39 : vector<8x256xf32>
    %41 = vector.extract_strided_slice %40 {offsets = [0, 0], sizes = [8, 192], strides = [1, 1]} : vector<8x256xf32> to vector<8x192xf32>
    %42 = arith.negf %41 : vector<8x192xf32>
    %43 = math.exp %42 : vector<8x192xf32>
    %cst_24 = arith.constant 1.000000e+00 : f32
    %44 = vector.broadcast %cst_24 : f32 to vector<8x192xf32>
    %45 = arith.addf %44, %43 : vector<8x192xf32>
    %46 = arith.divf %44, %45 : vector<8x192xf32>
    %47 = vector.extract_strided_slice %40 {offsets = [0, 192], sizes = [8, 64], strides = [1, 1]} : vector<8x256xf32> to vector<8x64xf32>
    %48 = math.tanh %47 : vector<8x64xf32>
    %49 = vector.extract_strided_slice %46 {offsets = [0, 0], sizes = [8, 64], strides = [1, 1]} : vector<8x192xf32> to vector<8x64xf32>
    %50 = vector.extract_strided_slice %46 {offsets = [0, 64], sizes = [8, 64], strides = [1, 1]} : vector<8x192xf32> to vector<8x64xf32>
    %51 = vector.extract_strided_slice %46 {offsets = [0, 128], sizes = [8, 64], strides = [1, 1]} : vector<8x192xf32> to vector<8x64xf32>
    %52 = arith.mulf %50, %33 : vector<8x64xf32>
    %53 = arith.mulf %49, %48 : vector<8x64xf32>
    %54 = arith.addf %52, %53 : vector<8x64xf32>
    %55 = math.tanh %54 : vector<8x64xf32>
    %56 = arith.mulf %51, %55 : vector<8x64xf32>
    %c2_i32 = arith.constant 2 : i32
    %57 = arith.index_cast %c2_i32 : i32 to index
    %c0_25 = arith.constant 0 : index
    %c0_26 = arith.constant 0 : index
    %58 = vector.load %arg17[%57, %c0_25, %c0_26] : memref<8x8x256xf32, #tpu.memory_space<vmem>>, vector<1x8x256xf32>
    %59 = vector.shape_cast %58 : vector<1x8x256xf32> to vector<8x256xf32>
    %cst_27 = arith.constant dense<0.000000e+00> : vector<8x256xf32>
    %60 = tpu.matmul %56, %12, %cst_27 {dimension_numbers = #tpu.dot_dimension_numbers<[1], [0], [0], [1], [0, 0, 1, 1], [], []>} : vector<8x64xf32>, vector<64x256xf32>, vector<8x256xf32> -> vector<8x256xf32>
    %61 = arith.addf %59, %60 : vector<8x256xf32>
    %62 = vector.extract_strided_slice %61 {offsets = [0, 0], sizes = [8, 192], strides = [1, 1]} : vector<8x256xf32> to vector<8x192xf32>
    %63 = arith.negf %62 : vector<8x192xf32>
    %64 = math.exp %63 : vector<8x192xf32>
    %cst_28 = arith.constant 1.000000e+00 : f32
    %65 = vector.broadcast %cst_28 : f32 to vector<8x192xf32>
    %66 = arith.addf %65, %64 : vector<8x192xf32>
    %67 = arith.divf %65, %66 : vector<8x192xf32>
    %68 = vector.extract_strided_slice %61 {offsets = [0, 192], sizes = [8, 64], strides = [1, 1]} : vector<8x256xf32> to vector<8x64xf32>
    %69 = math.tanh %68 : vector<8x64xf32>
    %70 = vector.extract_strided_slice %67 {offsets = [0, 0], sizes = [8, 64], strides = [1, 1]} : vector<8x192xf32> to vector<8x64xf32>
    %71 = vector.extract_strided_slice %67 {offsets = [0, 64], sizes = [8, 64], strides = [1, 1]} : vector<8x192xf32> to vector<8x64xf32>
    %72 = vector.extract_strided_slice %67 {offsets = [0, 128], sizes = [8, 64], strides = [1, 1]} : vector<8x192xf32> to vector<8x64xf32>
    %73 = arith.mulf %71, %54 : vector<8x64xf32>
    %74 = arith.mulf %70, %69 : vector<8x64xf32>
    %75 = arith.addf %73, %74 : vector<8x64xf32>
    %76 = math.tanh %75 : vector<8x64xf32>
    %77 = arith.mulf %72, %76 : vector<8x64xf32>
    %c3_i32 = arith.constant 3 : i32
    %78 = arith.index_cast %c3_i32 : i32 to index
    %c0_29 = arith.constant 0 : index
    %c0_30 = arith.constant 0 : index
    %79 = vector.load %arg17[%78, %c0_29, %c0_30] : memref<8x8x256xf32, #tpu.memory_space<vmem>>, vector<1x8x256xf32>
    %80 = vector.shape_cast %79 : vector<1x8x256xf32> to vector<8x256xf32>
    %cst_31 = arith.constant dense<0.000000e+00> : vector<8x256xf32>
    %81 = tpu.matmul %77, %12, %cst_31 {dimension_numbers = #tpu.dot_dimension_numbers<[1], [0], [0], [1], [0, 0, 1, 1], [], []>} : vector<8x64xf32>, vector<64x256xf32>, vector<8x256xf32> -> vector<8x256xf32>
    %82 = arith.addf %80, %81 : vector<8x256xf32>
    %83 = vector.extract_strided_slice %82 {offsets = [0, 0], sizes = [8, 192], strides = [1, 1]} : vector<8x256xf32> to vector<8x192xf32>
    %84 = arith.negf %83 : vector<8x192xf32>
    %85 = math.exp %84 : vector<8x192xf32>
    %cst_32 = arith.constant 1.000000e+00 : f32
    %86 = vector.broadcast %cst_32 : f32 to vector<8x192xf32>
    %87 = arith.addf %86, %85 : vector<8x192xf32>
    %88 = arith.divf %86, %87 : vector<8x192xf32>
    %89 = vector.extract_strided_slice %82 {offsets = [0, 192], sizes = [8, 64], strides = [1, 1]} : vector<8x256xf32> to vector<8x64xf32>
    %90 = math.tanh %89 : vector<8x64xf32>
    %91 = vector.extract_strided_slice %88 {offsets = [0, 0], sizes = [8, 64], strides = [1, 1]} : vector<8x192xf32> to vector<8x64xf32>
    %92 = vector.extract_strided_slice %88 {offsets = [0, 64], sizes = [8, 64], strides = [1, 1]} : vector<8x192xf32> to vector<8x64xf32>
    %93 = vector.extract_strided_slice %88 {offsets = [0, 128], sizes = [8, 64], strides = [1, 1]} : vector<8x192xf32> to vector<8x64xf32>
    %94 = arith.mulf %92, %75 : vector<8x64xf32>
    %95 = arith.mulf %91, %90 : vector<8x64xf32>
    %96 = arith.addf %94, %95 : vector<8x64xf32>
    %97 = math.tanh %96 : vector<8x64xf32>
    %98 = arith.mulf %93, %97 : vector<8x64xf32>
    %c4_i32 = arith.constant 4 : i32
    %99 = arith.index_cast %c4_i32 : i32 to index
    %c0_33 = arith.constant 0 : index
    %c0_34 = arith.constant 0 : index
    %100 = vector.load %arg17[%99, %c0_33, %c0_34] : memref<8x8x256xf32, #tpu.memory_space<vmem>>, vector<1x8x256xf32>
    %101 = vector.shape_cast %100 : vector<1x8x256xf32> to vector<8x256xf32>
    %cst_35 = arith.constant dense<0.000000e+00> : vector<8x256xf32>
    %102 = tpu.matmul %98, %12, %cst_35 {dimension_numbers = #tpu.dot_dimension_numbers<[1], [0], [0], [1], [0, 0, 1, 1], [], []>} : vector<8x64xf32>, vector<64x256xf32>, vector<8x256xf32> -> vector<8x256xf32>
    %103 = arith.addf %101, %102 : vector<8x256xf32>
    %104 = vector.extract_strided_slice %103 {offsets = [0, 0], sizes = [8, 192], strides = [1, 1]} : vector<8x256xf32> to vector<8x192xf32>
    %105 = arith.negf %104 : vector<8x192xf32>
    %106 = math.exp %105 : vector<8x192xf32>
    %cst_36 = arith.constant 1.000000e+00 : f32
    %107 = vector.broadcast %cst_36 : f32 to vector<8x192xf32>
    %108 = arith.addf %107, %106 : vector<8x192xf32>
    %109 = arith.divf %107, %108 : vector<8x192xf32>
    %110 = vector.extract_strided_slice %103 {offsets = [0, 192], sizes = [8, 64], strides = [1, 1]} : vector<8x256xf32> to vector<8x64xf32>
    %111 = math.tanh %110 : vector<8x64xf32>
    %112 = vector.extract_strided_slice %109 {offsets = [0, 0], sizes = [8, 64], strides = [1, 1]} : vector<8x192xf32> to vector<8x64xf32>
    %113 = vector.extract_strided_slice %109 {offsets = [0, 64], sizes = [8, 64], strides = [1, 1]} : vector<8x192xf32> to vector<8x64xf32>
    %114 = vector.extract_strided_slice %109 {offsets = [0, 128], sizes = [8, 64], strides = [1, 1]} : vector<8x192xf32> to vector<8x64xf32>
    %115 = arith.mulf %113, %96 : vector<8x64xf32>
    %116 = arith.mulf %112, %111 : vector<8x64xf32>
    %117 = arith.addf %115, %116 : vector<8x64xf32>
    %118 = math.tanh %117 : vector<8x64xf32>
    %119 = arith.mulf %114, %118 : vector<8x64xf32>
    %c5_i32 = arith.constant 5 : i32
    %120 = arith.index_cast %c5_i32 : i32 to index
    %c0_37 = arith.constant 0 : index
    %c0_38 = arith.constant 0 : index
    %121 = vector.load %arg17[%120, %c0_37, %c0_38] : memref<8x8x256xf32, #tpu.memory_space<vmem>>, vector<1x8x256xf32>
    %122 = vector.shape_cast %121 : vector<1x8x256xf32> to vector<8x256xf32>
    %cst_39 = arith.constant dense<0.000000e+00> : vector<8x256xf32>
    %123 = tpu.matmul %119, %12, %cst_39 {dimension_numbers = #tpu.dot_dimension_numbers<[1], [0], [0], [1], [0, 0, 1, 1], [], []>} : vector<8x64xf32>, vector<64x256xf32>, vector<8x256xf32> -> vector<8x256xf32>
    %124 = arith.addf %122, %123 : vector<8x256xf32>
    %125 = vector.extract_strided_slice %124 {offsets = [0, 0], sizes = [8, 192], strides = [1, 1]} : vector<8x256xf32> to vector<8x192xf32>
    %126 = arith.negf %125 : vector<8x192xf32>
    %127 = math.exp %126 : vector<8x192xf32>
    %cst_40 = arith.constant 1.000000e+00 : f32
    %128 = vector.broadcast %cst_40 : f32 to vector<8x192xf32>
    %129 = arith.addf %128, %127 : vector<8x192xf32>
    %130 = arith.divf %128, %129 : vector<8x192xf32>
    %131 = vector.extract_strided_slice %124 {offsets = [0, 192], sizes = [8, 64], strides = [1, 1]} : vector<8x256xf32> to vector<8x64xf32>
    %132 = math.tanh %131 : vector<8x64xf32>
    %133 = vector.extract_strided_slice %130 {offsets = [0, 0], sizes = [8, 64], strides = [1, 1]} : vector<8x192xf32> to vector<8x64xf32>
    %134 = vector.extract_strided_slice %130 {offsets = [0, 64], sizes = [8, 64], strides = [1, 1]} : vector<8x192xf32> to vector<8x64xf32>
    %135 = vector.extract_strided_slice %130 {offsets = [0, 128], sizes = [8, 64], strides = [1, 1]} : vector<8x192xf32> to vector<8x64xf32>
    %136 = arith.mulf %134, %117 : vector<8x64xf32>
    %137 = arith.mulf %133, %132 : vector<8x64xf32>
    %138 = arith.addf %136, %137 : vector<8x64xf32>
    %139 = math.tanh %138 : vector<8x64xf32>
    %140 = arith.mulf %135, %139 : vector<8x64xf32>
    %c6_i32 = arith.constant 6 : i32
    %141 = arith.index_cast %c6_i32 : i32 to index
    %c0_41 = arith.constant 0 : index
    %c0_42 = arith.constant 0 : index
    %142 = vector.load %arg17[%141, %c0_41, %c0_42] : memref<8x8x256xf32, #tpu.memory_space<vmem>>, vector<1x8x256xf32>
    %143 = vector.shape_cast %142 : vector<1x8x256xf32> to vector<8x256xf32>
    %cst_43 = arith.constant dense<0.000000e+00> : vector<8x256xf32>
    %144 = tpu.matmul %140, %12, %cst_43 {dimension_numbers = #tpu.dot_dimension_numbers<[1], [0], [0], [1], [0, 0, 1, 1], [], []>} : vector<8x64xf32>, vector<64x256xf32>, vector<8x256xf32> -> vector<8x256xf32>
    %145 = arith.addf %143, %144 : vector<8x256xf32>
    %146 = vector.extract_strided_slice %145 {offsets = [0, 0], sizes = [8, 192], strides = [1, 1]} : vector<8x256xf32> to vector<8x192xf32>
    %147 = arith.negf %146 : vector<8x192xf32>
    %148 = math.exp %147 : vector<8x192xf32>
    %cst_44 = arith.constant 1.000000e+00 : f32
    %149 = vector.broadcast %cst_44 : f32 to vector<8x192xf32>
    %150 = arith.addf %149, %148 : vector<8x192xf32>
    %151 = arith.divf %149, %150 : vector<8x192xf32>
    %152 = vector.extract_strided_slice %145 {offsets = [0, 192], sizes = [8, 64], strides = [1, 1]} : vector<8x256xf32> to vector<8x64xf32>
    %153 = math.tanh %152 : vector<8x64xf32>
    %154 = vector.extract_strided_slice %151 {offsets = [0, 0], sizes = [8, 64], strides = [1, 1]} : vector<8x192xf32> to vector<8x64xf32>
    %155 = vector.extract_strided_slice %151 {offsets = [0, 64], sizes = [8, 64], strides = [1, 1]} : vector<8x192xf32> to vector<8x64xf32>
    %156 = vector.extract_strided_slice %151 {offsets = [0, 128], sizes = [8, 64], strides = [1, 1]} : vector<8x192xf32> to vector<8x64xf32>
    %157 = arith.mulf %155, %138 : vector<8x64xf32>
    %158 = arith.mulf %154, %153 : vector<8x64xf32>
    %159 = arith.addf %157, %158 : vector<8x64xf32>
    %160 = math.tanh %159 : vector<8x64xf32>
    %161 = arith.mulf %156, %160 : vector<8x64xf32>
    %c7_i32 = arith.constant 7 : i32
    %162 = arith.index_cast %c7_i32 : i32 to index
    %c0_45 = arith.constant 0 : index
    %c0_46 = arith.constant 0 : index
    %163 = vector.load %arg17[%162, %c0_45, %c0_46] : memref<8x8x256xf32, #tpu.memory_space<vmem>>, vector<1x8x256xf32>
    %164 = vector.shape_cast %163 : vector<1x8x256xf32> to vector<8x256xf32>
    %cst_47 = arith.constant dense<0.000000e+00> : vector<8x256xf32>
    %165 = tpu.matmul %161, %12, %cst_47 {dimension_numbers = #tpu.dot_dimension_numbers<[1], [0], [0], [1], [0, 0, 1, 1], [], []>} : vector<8x64xf32>, vector<64x256xf32>, vector<8x256xf32> -> vector<8x256xf32>
    %166 = arith.addf %164, %165 : vector<8x256xf32>
    %167 = vector.extract_strided_slice %166 {offsets = [0, 0], sizes = [8, 192], strides = [1, 1]} : vector<8x256xf32> to vector<8x192xf32>
    %168 = arith.negf %167 : vector<8x192xf32>
    %169 = math.exp %168 : vector<8x192xf32>
    %cst_48 = arith.constant 1.000000e+00 : f32
    %170 = vector.broadcast %cst_48 : f32 to vector<8x192xf32>
    %171 = arith.addf %170, %169 : vector<8x192xf32>
    %172 = arith.divf %170, %171 : vector<8x192xf32>
    %173 = vector.extract_strided_slice %166 {offsets = [0, 192], sizes = [8, 64], strides = [1, 1]} : vector<8x256xf32> to vector<8x64xf32>
    %174 = math.tanh %173 : vector<8x64xf32>
    %175 = vector.extract_strided_slice %172 {offsets = [0, 0], sizes = [8, 64], strides = [1, 1]} : vector<8x192xf32> to vector<8x64xf32>
    %176 = vector.extract_strided_slice %172 {offsets = [0, 64], sizes = [8, 64], strides = [1, 1]} : vector<8x192xf32> to vector<8x64xf32>
    %177 = vector.extract_strided_slice %172 {offsets = [0, 128], sizes = [8, 64], strides = [1, 1]} : vector<8x192xf32> to vector<8x64xf32>
    %178 = arith.mulf %176, %159 : vector<8x64xf32>
    %179 = arith.mulf %175, %174 : vector<8x64xf32>
    %180 = arith.addf %178, %179 : vector<8x64xf32>
    %181 = math.tanh %180 : vector<8x64xf32>
    %182 = arith.mulf %177, %181 : vector<8x64xf32>
    %c8_i32 = arith.constant 8 : i32
    %c0_49 = arith.constant 0 : index
    %c0_50 = arith.constant 0 : index
    %183 = vector.load %arg18[%c0_49, %c0_50] : memref<8x64xf32, #tpu.memory_space<vmem>>, vector<8x64xf32>
    tpu.vector_store %arg18[%c0_49, %c0_50], %182 {strides = array<i32>} : memref<8x64xf32, #tpu.memory_space<vmem>>, vector<8x64xf32>,
    %c0_51 = arith.constant 0 : index
    %c0_52 = arith.constant 0 : index
    %184 = vector.load %arg19[%c0_51, %c0_52] : memref<8x64xf32, #tpu.memory_space<vmem>>, vector<8x64xf32>
    tpu.vector_store %arg19[%c0_51, %c0_52], %180 {strides = array<i32>} : memref<8x64xf32, #tpu.memory_space<vmem>>, vector<8x64xf32>,
    %c0_i32_53 = arith.constant 0 : i32
    %185 = arith.cmpi eq, %arg1, %c0_i32_53 : i32
    %186 = arith.extui %185 : i1 to i32
    %c0_i32_54 = arith.constant 0 : i32
    %187 = arith.cmpi ne, %186, %c0_i32_54 : i32
    scf.if %187 {
      %c0_55 = arith.constant 0 : index
      %c0_56 = arith.constant 0 : index
      %188 = vector.load %arg18[%c0_55, %c0_56] : memref<8x64xf32, #tpu.memory_space<vmem>>, vector<8x64xf32>
      %c0_57 = arith.constant 0 : index
      %c0_58 = arith.constant 0 : index
      %189 = vector.load %arg7[%c0_57, %c0_58] : memref<64x32xf32, #tpu.memory_space<vmem>>, vector<64x32xf32>
      %cst_59 = arith.constant dense<0.000000e+00> : vector<8x32xf32>
      %190 = tpu.matmul %188, %189, %cst_59 {dimension_numbers = #tpu.dot_dimension_numbers<[1], [0], [0], [1], [0, 0, 1, 1], [], []>} : vector<8x64xf32>, vector<64x32xf32>, vector<8x32xf32> -> vector<8x32xf32>
      %c0_60 = arith.constant 0 : index
      %c0_61 = arith.constant 0 : index
      %191 = vector.load %arg8[%c0_60, %c0_61] : memref<1x32xf32, #tpu.memory_space<vmem>>, vector<1x32xf32>
      %192 = vector.broadcast %191 : vector<1x32xf32> to vector<8x32xf32>
      %193 = arith.addf %190, %192 : vector<8x32xf32>
      %cst_62 = arith.constant 0.000000e+00 : f32
      %194 = vector.broadcast %cst_62 : f32 to vector<8x32xf32>
      %195 = arith.maximumf %193, %194 : vector<8x32xf32>
      %c0_63 = arith.constant 0 : index
      %c0_64 = arith.constant 0 : index
      %196 = vector.load %arg3[%c0_63, %c0_64] : memref<8x6xf32, #tpu.memory_space<vmem>>, vector<8x6xf32>
      %c0_65 = arith.constant 0 : index
      %c0_66 = arith.constant 0 : index
      %197 = vector.load %arg9[%c0_65, %c0_66] : memref<6x64xf32, #tpu.memory_space<vmem>>, vector<6x64xf32>
      %cst_67 = arith.constant dense<0.000000e+00> : vector<8x64xf32>
      %198 = tpu.matmul %196, %197, %cst_67 {dimension_numbers = #tpu.dot_dimension_numbers<[1], [0], [0], [1], [0, 0, 1, 1], [], []>} : vector<8x6xf32>, vector<6x64xf32>, vector<8x64xf32> -> vector<8x64xf32>
      %c0_68 = arith.constant 0 : index
      %c0_69 = arith.constant 0 : index
      %199 = vector.load %arg10[%c0_68, %c0_69] : memref<1x64xf32, #tpu.memory_space<vmem>>, vector<1x64xf32>
      %200 = vector.broadcast %199 : vector<1x64xf32> to vector<8x64xf32>
      %201 = arith.addf %198, %200 : vector<8x64xf32>
      %cst_70 = arith.constant 0.000000e+00 : f32
      %202 = vector.broadcast %cst_70 : f32 to vector<8x64xf32>
      %203 = arith.maximumf %201, %202 : vector<8x64xf32>
      %c0_71 = arith.constant 0 : index
      %c0_72 = arith.constant 0 : index
      %204 = vector.load %arg11[%c0_71, %c0_72] : memref<64x32xf32, #tpu.memory_space<vmem>>, vector<64x32xf32>
      %cst_73 = arith.constant dense<0.000000e+00> : vector<8x32xf32>
      %205 = tpu.matmul %203, %204, %cst_73 {dimension_numbers = #tpu.dot_dimension_numbers<[1], [0], [0], [1], [0, 0, 1, 1], [], []>} : vector<8x64xf32>, vector<64x32xf32>, vector<8x32xf32> -> vector<8x32xf32>
      %c0_74 = arith.constant 0 : index
      %c0_75 = arith.constant 0 : index
      %206 = vector.load %arg12[%c0_74, %c0_75] : memref<1x32xf32, #tpu.memory_space<vmem>>, vector<1x32xf32>
      %207 = vector.broadcast %206 : vector<1x32xf32> to vector<8x32xf32>
      %208 = arith.addf %205, %207 : vector<8x32xf32>
      %cst_76 = arith.constant 0.000000e+00 : f32
      %209 = vector.broadcast %cst_76 : f32 to vector<8x32xf32>
      %210 = arith.maximumf %208, %209 : vector<8x32xf32>
      %c0_77 = arith.constant 0 : index
      %c0_78 = arith.constant 0 : index
      %211 = vector.load %arg13[%c0_77, %c0_78] : memref<32x32xf32, #tpu.memory_space<vmem>>, vector<32x32xf32>
      %cst_79 = arith.constant dense<0.000000e+00> : vector<8x32xf32>
      %212 = tpu.matmul %195, %211, %cst_79 {dimension_numbers = #tpu.dot_dimension_numbers<[1], [0], [0], [1], [0, 0, 1, 1], [], []>} : vector<8x32xf32>, vector<32x32xf32>, vector<8x32xf32> -> vector<8x32xf32>
      %c0_80 = arith.constant 0 : index
      %c0_81 = arith.constant 0 : index
      %213 = vector.load %arg14[%c0_80, %c0_81] : memref<32x32xf32, #tpu.memory_space<vmem>>, vector<32x32xf32>
      %cst_82 = arith.constant dense<0.000000e+00> : vector<8x32xf32>
      %214 = tpu.matmul %210, %213, %cst_82 {dimension_numbers = #tpu.dot_dimension_numbers<[1], [0], [0], [1], [0, 0, 1, 1], [], []>} : vector<8x32xf32>, vector<32x32xf32>, vector<8x32xf32> -> vector<8x32xf32>
      %215 = arith.addf %212, %214 : vector<8x32xf32>
      %c0_83 = arith.constant 0 : index
      %c0_84 = arith.constant 0 : index
      %216 = vector.load %arg15[%c0_83, %c0_84] : memref<1x32xf32, #tpu.memory_space<vmem>>, vector<1x32xf32>
      %217 = vector.broadcast %216 : vector<1x32xf32> to vector<8x32xf32>
      %218 = arith.addf %215, %217 : vector<8x32xf32>
      %cst_85 = arith.constant 0.000000e+00 : f32
      %219 = vector.broadcast %cst_85 : f32 to vector<8x32xf32>
      %220 = arith.maximumf %218, %219 : vector<8x32xf32>
      %c0_86 = arith.constant 0 : index
      %c0_87 = arith.constant 0 : index
      %221 = vector.load %arg16[%c0_86, %c0_87] : memref<8x32xf32, #tpu.memory_space<vmem>>, vector<8x32xf32>
      tpu.vector_store %arg16[%c0_86, %c0_87], %220 {strides = array<i32>} : memref<8x32xf32, #tpu.memory_space<vmem>>, vector<8x32xf32>,
    } else {
    }
    return
  }
  func.func @transform_0(%arg0: i32, %arg1: i32) -> (i32, i32, i32) {
    %c0_i32 = arith.constant 0 : i32
    %c0_i32_0 = arith.constant 0 : i32
    return %arg1, %arg0, %c0_i32 : i32, i32, i32
  }
  func.func @transform_1(%arg0: i32, %arg1: i32) -> (i32, i32) {
    %c0_i32 = arith.constant 0 : i32
    %c0_i32_0 = arith.constant 0 : i32
    return %arg0, %c0_i32 : i32, i32
  }
  func.func @transform_2(%arg0: i32, %arg1: i32) -> (i32, i32) {
    %c0_i32 = arith.constant 0 : i32
    %c0_i32_0 = arith.constant 0 : i32
    %c0_i32_1 = arith.constant 0 : i32
    return %c0_i32, %c0_i32_0 : i32, i32
  }
  func.func @transform_3(%arg0: i32, %arg1: i32) -> (i32, i32) {
    %c0_i32 = arith.constant 0 : i32
    %c0_i32_0 = arith.constant 0 : i32
    %c0_i32_1 = arith.constant 0 : i32
    return %c0_i32, %c0_i32_0 : i32, i32
  }
  func.func @transform_4(%arg0: i32, %arg1: i32) -> (i32, i32) {
    %c0_i32 = arith.constant 0 : i32
    %c0_i32_0 = arith.constant 0 : i32
    %c0_i32_1 = arith.constant 0 : i32
    return %c0_i32, %c0_i32_0 : i32, i32
  }
  func.func @transform_5(%arg0: i32, %arg1: i32) -> (i32, i32) {
    %c0_i32 = arith.constant 0 : i32
    %c0_i32_0 = arith.constant 0 : i32
    %c0_i32_1 = arith.constant 0 : i32
    return %c0_i32, %c0_i32_0 : i32, i32
  }
  func.func @transform_6(%arg0: i32, %arg1: i32) -> (i32, i32) {
    %c0_i32 = arith.constant 0 : i32
    %c0_i32_0 = arith.constant 0 : i32
    %c0_i32_1 = arith.constant 0 : i32
    return %c0_i32, %c0_i32_0 : i32, i32
  }
  func.func @transform_7(%arg0: i32, %arg1: i32) -> (i32, i32) {
    %c0_i32 = arith.constant 0 : i32
    %c0_i32_0 = arith.constant 0 : i32
    %c0_i32_1 = arith.constant 0 : i32
    return %c0_i32, %c0_i32_0 : i32, i32
  }
  func.func @transform_8(%arg0: i32, %arg1: i32) -> (i32, i32) {
    %c0_i32 = arith.constant 0 : i32
    %c0_i32_0 = arith.constant 0 : i32
    %c0_i32_1 = arith.constant 0 : i32
    return %c0_i32, %c0_i32_0 : i32, i32
  }
  func.func @transform_9(%arg0: i32, %arg1: i32) -> (i32, i32) {
    %c0_i32 = arith.constant 0 : i32
    %c0_i32_0 = arith.constant 0 : i32
    %c0_i32_1 = arith.constant 0 : i32
    return %c0_i32, %c0_i32_0 : i32, i32
  }
  func.func @transform_10(%arg0: i32, %arg1: i32) -> (i32, i32) {
    %c0_i32 = arith.constant 0 : i32
    %c0_i32_0 = arith.constant 0 : i32
    %c0_i32_1 = arith.constant 0 : i32
    return %c0_i32, %c0_i32_0 : i32, i32
  }
  func.func @transform_11(%arg0: i32, %arg1: i32) -> (i32, i32) {
    %c0_i32 = arith.constant 0 : i32
    %c0_i32_0 = arith.constant 0 : i32
    %c0_i32_1 = arith.constant 0 : i32
    return %c0_i32, %c0_i32_0 : i32, i32
  }
  func.func @transform_12(%arg0: i32, %arg1: i32) -> (i32, i32) {
    %c0_i32 = arith.constant 0 : i32
    %c0_i32_0 = arith.constant 0 : i32
    %c0_i32_1 = arith.constant 0 : i32
    return %c0_i32, %c0_i32_0 : i32, i32
  }
  func.func @transform_13(%arg0: i32, %arg1: i32) -> (i32, i32) {
    %c0_i32 = arith.constant 0 : i32
    %c0_i32_0 = arith.constant 0 : i32
    %c0_i32_1 = arith.constant 0 : i32
    return %c0_i32, %c0_i32_0 : i32, i32
  }
  func.func @transform_14(%arg0: i32, %arg1: i32) -> (i32, i32) {
    %c0_i32 = arith.constant 0 : i32
    %c0_i32_0 = arith.constant 0 : i32
    return %arg0, %c0_i32 : i32, i32
  }
}

</mosaic_0001>

<bundles_post_ra>
// kernel: hybrid_forward.1
= control target key start
LH: loop header
LB: loop body
LE: loop exit
PB: predicated region body
PF: predicated region fallthrough
CT: control target
= control target key end

     0   :  { %vm51_vm0 = vcmask 523264   ;;  %v1805_v3 = vmov 0.0   ;;  %vm76_vm1 = vcmask 64512   ;;  %v66_v21 = vlaneseq  ;;  %s1806_s19 = smov 64   ;;  %s2369_s4 = inlined_call_operand.vmem [shape: f32[64,256], index: 4, kind: input, shape index: {}]   ;;  %s2370_s2 = inlined_call_operand.vmem [shape: f32[8,256], index: 2, kind: input, shape index: {}]   ;;  %s2371_s0 = inlined_call_operand.vmem [shape: f32[8,8,8], index: 0, kind: input, shape index: {}]   ;;  %s2372_s3 = inlined_call_operand.vmem [shape: f32[1,256], index: 3, kind: input, shape index: {}]   ;;  %s2373_s7 = inlined_call_operand.vmem [shape: f32[6,64], index: 7, kind: input, shape index: {}]   ;;  %s2374_s1 = inlined_call_operand.vmem [shape: f32[8,6], index: 1, kind: input, shape index: {}]   ;;  %s2375_s5 = inlined_call_operand.vmem [shape: f32[64,32], index: 5, kind: input, shape index: {}]   ;;  %s2376_s9 = inlined_call_operand.vmem [shape: f32[64,32], index: 9, kind: input, shape index: {}]   ;;  %s2377_s8 = inlined_call_operand.vmem [shape: f32[1,64], index: 8, kind: input, shape index: {}]   ;;  %s2378_s12 = inlined_call_operand.vmem [shape: f32[32,32], index: 12, kind: input, shape index: {}]   ;;  %s2379_s10 = inlined_call_operand.vmem [shape: f32[1,32], index: 10, kind: input, shape index: {}]   ;;  %s2380_s11 = inlined_call_operand.vmem [shape: f32[32,32], index: 11, kind: input, shape index: {}]   ;;  %s2381_s6 = inlined_call_operand.vmem [shape: f32[1,32], index: 6, kind: input, shape index: {}]   ;;  %s2382_s13 = inlined_call_operand.vmem [shape: f32[1,32], index: 13, kind: input, shape index: {}]   ;;  %s2383_s14 = inlined_call_operand.vmem [shape: f32[8,32], index: 14, kind: output, shape index: {}]  }
   0x1   :  { %v1886_v0 = vld [vmem:[%s2369_s4 + $0x78] sm:$0xff]  ;;  %v1891_v1 = vld [vmem:[%s2369_s4 + $0x70] sm:$0xff]  ;;  %v1896_v2 = vld [vmem:[%s2369_s4 + $0x68] sm:$0xff]  ;;  %165 = vmatprep.mubr.f32.mxu0 %v1805_v3  ;;  %318 = vmatprep.mubr.f32.mxu1 %v1805_v3  ;;  %52 = vst.msk [vmem:[#allocation3] sm:$0xff] %vm51_vm0, %v1805_v3  ;;  %vm1236_vm2 = vcmask 1045504   ;;  %vm1232_vm3 = vcmask 48128  }
   0x2   :  { %53 = vst.msk [vmem:[#allocation4] sm:$0xff] %vm51_vm0, %v1805_v3  ;;  %270 = vmatprep.subr.mxu1 %v1886_v0  ;;  %v1908_v4 = vld [vmem:[%s2369_s4 + $0x60] sm:$0xff]  ;;  %v1914_v5 = vld [vmem:[%s2369_s4 + $0x58] sm:$0xff]  ;;  %v1920_v6 = vld [vmem:[%s2369_s4 + $0x50] sm:$0xff]  ;;  %v67_v22 = vshrl.u32 %v66_v21, 7  ;;  %vm1807_vm4 = vmmov 0  }
   0x3   :  { %271 = vmatpush1.msra.mxu1 %v1891_v1  ;;  %v63_v7 = vld [vmem:[%s2370_s2 + $0x8] sm:$0xff]  ;;  %v62_v9 = vld [vmem:[%s2370_s2] sm:$0xff]  ;;  %v1947_v12 = vld [vmem:[%s2369_s4 + $0x38] sm:$0xff]  ;;  %vm1408_vm5 = vcmask 261120  }
   0x4   :  { %272 = vmatprep.subr.mxu1 %v1896_v2  ;;  %v1929_v8 = vld [vmem:[%s2369_s4 + $0x48] sm:$0xff]  ;;  %131 = vmatprep.subr.mxu0 %v63_v7  ;;  %v54_v10 = vld [vmem:[%s2371_s0] sm:$0xff]  ;;  %v1954_v13 = vld [vmem:[%s2369_s4 + $0x30] sm:$0xff]  ;;  %v68_v23 = vsub.s32 0, %v67_v22  ;;  %v72_v26 = vsub.s32 1, %v67_v22 }
   0x5   :  { %273 = vmatpush1.msra.mxu1 %v1908_v4  ;;  %v1941_v11 = vld [vmem:[%s2369_s4 + $0x40] sm:$0xff]  ;;  %132 = vmatpush1.msra.mxu0 %v62_v9  ;;  %v1961_v14 = vld [vmem:[%s2369_s4 + $0x28] sm:$0xff]  ;;  %v1975_v16 = vld [vmem:[%s2369_s4 + $0x18] sm:$0xff] }
   0x6   :  { %274 = vmatprep.subr.mxu1 %v1914_v5  ;;  %1569 = vmatmul.mubr.msk.f32.vlgmr.msra.gmra.mxu0 %vm76_vm1, %v54_v10  ;;  %v1968_v15 = vld [vmem:[%s2369_s4 + $0x20] sm:$0xff]  ;;  %v1982_v17 = vld [vmem:[%s2369_s4 + $0x10] sm:$0xff]  ;;  %v1989_v18 = vld [vmem:[%s2369_s4 + $0x8] sm:$0xff] }
   0x7   :  { %275 = vmatpush1.msra.mxu1 %v1920_v6  ;;  %171 = vmatprep.mubr.f32.mxu0 %v1805_v3  ;;  %v1996_v19 = vld [vmem:[%s2369_s4] sm:$0xff]  ;;  %v55_v44 = vld [vmem:[%s2371_s0 + $0x8] sm:$0xff] }
   0x8   :  { %276 = vmatprep.subr.mxu1 %v1929_v8  ;;  %492 = vmatprep.subr.mxu0 %v1886_v0  ;;  %v246_v20 = vld [vmem:[#allocation3] sm:$0xff] }
   0x9   :  { %277 = vmatpush1.msra.mxu1 %v1941_v11  ;;  %493 = vmatpush1.msra.mxu0 %v1891_v1  ;;  %v64_v24 = vld [vmem:[%s2372_s3] sm:$0x3]  ;;  %v247_v37 = vld [vmem:[#allocation4] sm:$0xff] }
   0xa   :  { %278 = vmatprep.subr.mxu1 %v1947_v12  ;;  %494 = vmatprep.subr.mxu0 %v1896_v2  ;;  %v2035_v25 = vrot.slane %v64_v24, %v68_v23  ;;  %v2038_v29 = vrot.slane %v64_v24, %v72_v26  ;;  %v56_v24 = vld [vmem:[%s2371_s0 + $0x10] sm:$0xff]  ;;  %v57_v26 = vld [vmem:[%s2371_s0 + $0x18] sm:$0xff] }
   0xb   :  { %279 = vmatpush1.msra.mxu1 %v1954_v13  ;;  %495 = vmatpush1.msra.mxu0 %v1908_v4 }
   0xc   :  { %280 = vmatprep.subr.mxu1 %v1961_v14  ;;  %496 = vmatprep.subr.mxu0 %v1914_v5 }
   0xd   :  { %281 = vmatpush1.msra.mxu1 %v1968_v15  ;;  %497 = vmatpush1.msra.mxu0 %v1920_v6 }
   0xe   :  { %282 = vmatprep.subr.mxu1 %v1975_v16  ;;  %498 = vmatprep.subr.mxu0 %v1929_v8 }
   0xf   :  { %283 = vmatpush1.msra.mxu1 %v1982_v17  ;;  %499 = vmatpush1.msra.mxu0 %v1941_v11 }
  0x10   :  { %284 = vmatprep.subr.mxu1 %v1989_v18  ;;  %500 = vmatprep.subr.mxu0 %v1947_v12 }
  0x11   :  { %285 = vmatpush1.msra.mxu1 %v1996_v19  ;;  %501 = vmatpush1.msra.mxu0 %v1954_v13 }
  0x12   :  { %1577 = vmatmul.mubr.msk.f32.vlgmr.msra.gmra.mxu1 %vm51_vm0, %v246_v20  ;;  %383 = vmatprep.subr.mxu1 %v1886_v0 }
  0x13   :  { %384 = vmatpush1.msra.mxu1 %v1891_v1  ;;  %431 = vmatprep.mubr.f32.mxu1 %v1805_v3 }
  0x14   :  { %385 = vmatprep.subr.mxu1 %v1896_v2  ;;  %502 = vmatprep.subr.mxu0 %v1961_v14 }
  0x15   :  { %386 = vmatpush1.msra.mxu1 %v1908_v4  ;;  %503 = vmatpush1.msra.mxu0 %v1968_v15 }
  0x16   :  { %387 = vmatprep.subr.mxu1 %v1914_v5  ;;  %504 = vmatprep.subr.mxu0 %v1975_v16 }
  0x17   :  { %388 = vmatpush1.msra.mxu1 %v1920_v6  ;;  %505 = vmatpush1.msra.mxu0 %v1982_v17 }
  0x18   :  { %389 = vmatprep.subr.mxu1 %v1929_v8  ;;  %506 = vmatprep.subr.mxu0 %v1989_v18 }
  0x19   :  { %390 = vmatpush1.msra.mxu1 %v1941_v11  ;;  %507 = vmatpush1.msra.mxu0 %v1996_v19 }
  0x1a   :  { %391 = vmatprep.subr.mxu1 %v1947_v12  ;;  %710 = vmatprep.subr.mxu0 %v1886_v0 }
  0x1b   :  { %392 = vmatpush1.msra.mxu1 %v1954_v13  ;;  %1570 = vmatmul.mubr.msk.f32.gmra.mxu0 %vm76_vm1, %v55_v44 }
  0x1c   :  { %393 = vmatprep.subr.mxu1 %v1961_v14  ;;  %177 = vmatprep.mubr.f32.mxu0 %v1805_v3 }
  0x1d   :  { %394 = vmatpush1.msra.mxu1 %v1968_v15 }
  0x1e   :  { %395 = vmatprep.subr.mxu1 %v1975_v16 }
  0x1f   :  { %396 = vmatpush1.msra.mxu1 %v1982_v17  ;;  %1571 = vmatmul.mubr.msk.f32.gmra.mxu0 %vm76_vm1, %v56_v24 }
  0x20   :  { %397 = vmatprep.subr.mxu1 %v1989_v18  ;;  %183 = vmatprep.mubr.f32.mxu0 %v1805_v3 }
  0x21   :  { %398 = vmatpush1.msra.mxu1 %v1996_v19 }
  0x22   :  { %601 = vmatprep.subr.mxu1 %v1886_v0 }
  0x23   :  { %1572 = vmatmul.mubr.msk.f32.gmra.mxu0 %vm76_vm1, %v57_v26 }
  0x24   :  { %189 = vmatprep.mubr.f32.mxu0 %v1805_v3 }
  0xc6   :  { %v167_v27 = vpop.f32.mrf.mxu0 }
  0xc7   :  { %v168_v28 = vadd.f32 %v167_v27, %v2035_v25  ;;  %v58_v27 = vld [vmem:[%s2371_s0 + $0x20] sm:$0xff] }
  0xc8   :  { %v169_v30 = vpop.f32.mrf.mxu0  ;;  %1573 = vmatmul.mubr.msk.f32.gmra.mxu0 %vm76_vm1, %v58_v27 }
  0xc9   :  { %v170_v32 = vadd.f32 %v169_v30, %v2038_v29  ;;  %195 = vmatprep.mubr.f32.mxu0 %v1805_v3  ;;  %v60_v30 = vld [vmem:[%s2371_s0 + $0x30] sm:$0xff] }
  0xd2   :  { %v320_v31 = vpop.f32.mrf.mxu1 }
  0xd3   :  { %v325_v33 = vadd.f32 %v320_v31, %v168_v28  ;;  %v59_v28 = vld [vmem:[%s2371_s0 + $0x28] sm:$0xff]  ;;  %v61_v31 = vld [vmem:[%s2371_s0 + $0x38] sm:$0xff] }
  0xd4   :  { %v322_v34 = vpop.f32.mrf.mxu1  ;;  %1574 = vmatmul.mubr.msk.f32.gmra.mxu0 %vm76_vm1, %v59_v28 }
  0xd5   :  { %v326_v35 = vadd.f32 %v322_v34, %v170_v32  ;;  %v1578_v38 = vmul.f32 -1.442695, %v325_v33  ;;  %201 = vmatprep.mubr.f32.mxu0 %v1805_v3 }
  0xd7   :  { %1709 = vtanh.f32 %v326_v35  ;;  %v1579_v50 = vmul.f32 -1.442695, %v326_v35 }
  0xd8   :  { %1711 = vpow2.f32 %v1578_v38  ;;  %1575 = vmatmul.mubr.msk.f32.gmra.mxu0 %vm76_vm1, %v60_v30 }
  0xd9   :  { %207 = vmatprep.mubr.f32.mxu0 %v1805_v3 }
  0xdb   :  { %v173_v56 = vpop.f32.mrf.mxu0 }
  0xdc   :  { %v174_v57 = vadd.f32 %v173_v56, %v2035_v25  ;;  %1576 = vmatmul.mubr.msk.f32.gmra.mxu0 %vm76_vm1, %v61_v31 }
  0xdd   :  { %v175_v58 = vpop.f32.mrf.mxu0  ;;  %540 = vmatprep.mubr.f32.mxu0 %v1805_v3 }
  0xde   :  { %v176_v60 = vadd.f32 %v175_v58, %v2038_v29 }
  0xe4   :  { %v1710_v36 = vpop.eup %1709 }
  0xe5   :  { %346 = vrot.lane.b32.xlu0 %v1710_v36, %s1806_s19  ;;  %v1712_v39 = vpop.eup %1711 }
  0xe6   :  { %v333_v40 = vadd.f32 1.0, %v1712_v39 }
  0xe8   :  { %1713 = vrcp.f32 %v333_v40 }
  0xe9   :  { %341 = vrot.lane.b32.xlu0 %v247_v37, %s1806_s19 }
  0xf5   :  { %v1714_v41 = vpop.eup %1713 }
 0x157   :  { %v347_v42 = vpop.permute.xlu0 %346 }
 0x158   :  { %v349_v43 = vmul.f32 %v1714_v41, %v347_v42  ;;  %v179_v42 = vpop.f32.mrf.mxu0 }
 0x15a   :  { %351 = vrot.lane.b32.xlu1 %v349_v43, %s1806_s19  ;;  %v181_v43 = vpop.f32.mrf.mxu0 }
 0x15b   :  { %v342_v45 = vpop.permute.xlu0 %341  ;;  %v182_v56 = vadd.f32 %v181_v43, %v2038_v29 }
 0x15c   :  { %v344_v46 = vmul.f32 %v1714_v41, %v342_v45  ;;  %v185_v44 = vpop.f32.mrf.mxu0 }
 0x15e   :  { %v187_v45 = vpop.f32.mrf.mxu0 }
 0x1cc   :  { %v352_v47 = vpop.permute.xlu1 %351 }
 0x1cd   :  { %v2049_v48 = vadd.f32 %v352_v47, %v344_v46  ;;  %v2125_v46 = vpop.f32.mrf.mxu0 }
 0x1cf   :  { %1715 = vtanh.f32 %v2049_v48  ;;  %v2127_v47 = vpop.f32.mrf.mxu0 }
 0x1d0   :  { %1717 = vpow2.f32 %v1579_v50 }
 0x1dc   :  { %v1716_v49 = vpop.eup %1715 }
 0x1dd   :  { %357 = vrot.lane.b32.xlu1 %v1716_v49, %s1806_s19  ;;  %v1718_v51 = vpop.eup %1717 }
 0x1de   :  { %v334_v52 = vadd.f32 1.0, %v1718_v51 }
 0x1e0   :  { %1719 = vrcp.f32 %v334_v52 }
 0x1ed   :  { %v1720_v53 = vpop.eup %1719 }
 0x24f   :  { %v358_v54 = vpop.permute.xlu1 %357 }
 0x250   :  { %v360_v55 = vmul.f32 %v1720_v53, %v358_v54  ;;  %v180_v54 = vadd.f32 %v179_v42, %v2035_v25 }
 0x252   :  { %1580 = vmatmul.mubr.msk.f32.vlgmr.msra.gmra.mxu1 %vm51_vm0, %v360_v55 }
 0x253   :  { %602 = vmatpush1.msra.mxu1 %v1891_v1  ;;  %649 = vmatprep.mubr.f32.mxu1 %v1805_v3 }
 0x254   :  { %603 = vmatprep.subr.mxu1 %v1896_v2 }
 0x255   :  { %604 = vmatpush1.msra.mxu1 %v1908_v4 }
 0x256   :  { %605 = vmatprep.subr.mxu1 %v1914_v5 }
 0x257   :  { %606 = vmatpush1.msra.mxu1 %v1920_v6 }
 0x258   :  { %607 = vmatprep.subr.mxu1 %v1929_v8 }
 0x259   :  { %608 = vmatpush1.msra.mxu1 %v1941_v11 }
 0x25a   :  { %609 = vmatprep.subr.mxu1 %v1947_v12 }
 0x25b   :  { %610 = vmatpush1.msra.mxu1 %v1954_v13 }
 0x25c   :  { %611 = vmatprep.subr.mxu1 %v1961_v14 }
 0x25d   :  { %612 = vmatpush1.msra.mxu1 %v1968_v15 }
 0x25e   :  { %613 = vmatprep.subr.mxu1 %v1975_v16 }
 0x25f   :  { %614 = vmatpush1.msra.mxu1 %v1982_v17 }
 0x260   :  { %615 = vmatprep.subr.mxu1 %v1989_v18 }
 0x261   :  { %616 = vmatpush1.msra.mxu1 %v1996_v19 }
 0x262   :  { %819 = vmatprep.subr.mxu1 %v1886_v0 }
 0x312   :  { %v433_v59 = vpop.f32.mrf.mxu1 }
 0x313   :  { %v438_v61 = vadd.f32 %v433_v59, %v174_v57 }
 0x314   :  { %v435_v62 = vpop.f32.mrf.mxu1 }
 0x315   :  { %v439_v63 = vadd.f32 %v435_v62, %v176_v60  ;;  %v1581_v9 = vmul.f32 -1.442695, %v438_v61 }
 0x317   :  { %1721 = vtanh.f32 %v439_v63  ;;  %v1582_v36 = vmul.f32 -1.442695, %v439_v63 }
 0x318   :  { %1723 = vpow2.f32 %v1581_v9 }
 0x324   :  { %v1722_v7 = vpop.eup %1721 }
 0x325   :  { %455 = vrot.lane.b32.xlu0 %v1722_v7, %s1806_s19  ;;  %v1724_v10 = vpop.eup %1723 }
 0x326   :  { %v446_v20 = vadd.f32 1.0, %v1724_v10 }
 0x328   :  { %1725 = vrcp.f32 %v446_v20 }
 0x335   :  { %v1726_v21 = vpop.eup %1725 }
 0x336   :  { %v453_v32 = vmul.f32 %v1726_v21, %v2049_v48  ;;  %v2129_v48 = vpop.f32.mrf.mxu0 }
 0x338   :  { %v2131_v49 = vpop.f32.mrf.mxu0 }
 0x33a   :  { %v2133_v50 = vpop.f32.mrf.mxu0 }
 0x33c   :  { %v2135_v51 = vpop.f32.mrf.mxu0 }
 0x33e   :  { %v2137_v52 = vpop.f32.mrf.mxu0 }
 0x340   :  { %v2139_v53 = vpop.f32.mrf.mxu0 }
 0x397   :  { %v456_v22 = vpop.permute.xlu0 %455 }
 0x398   :  { %v458_v23 = vmul.f32 %v1726_v21, %v456_v22 }
 0x39a   :  { %460 = vrot.lane.b32.xlu1 %v458_v23, %s1806_s19 }
 0x40c   :  { %v461_v33 = vpop.permute.xlu1 %460 }
 0x40d   :  { %v463_v34 = vadd.f32 %v461_v33, %v453_v32  ;;  %v186_v32 = vadd.f32 %v185_v44, %v2035_v25 }
 0x40f   :  { %1727 = vtanh.f32 %v463_v34 }
 0x410   :  { %1729 = vpow2.f32 %v1582_v36 }
 0x41c   :  { %v1728_v35 = vpop.eup %1727 }
 0x41d   :  { %466 = vrot.lane.b32.xlu0 %v1728_v35, %s1806_s19  ;;  %v1730_v37 = vpop.eup %1729 }
 0x41e   :  { %v447_v38 = vadd.f32 1.0, %v1730_v37 }
 0x420   :  { %1731 = vrcp.f32 %v447_v38 }
 0x42d   :  { %v1732_v39 = vpop.eup %1731 }
 0x48f   :  { %v467_v40 = vpop.permute.xlu0 %466 }
 0x490   :  { %v469_v41 = vmul.f32 %v1732_v39, %v467_v40 }
 0x492   :  { %1583 = vmatmul.mubr.msk.f32.vlgmr.msra.gmra.mxu0 %vm51_vm0, %v469_v41 }
 0x493   :  { %711 = vmatpush1.msra.mxu0 %v1891_v1  ;;  %758 = vmatprep.mubr.f32.mxu0 %v1805_v3 }
 0x494   :  { %712 = vmatprep.subr.mxu0 %v1896_v2 }
 0x495   :  { %713 = vmatpush1.msra.mxu0 %v1908_v4 }
 0x496   :  { %714 = vmatprep.subr.mxu0 %v1914_v5 }
 0x497   :  { %715 = vmatpush1.msra.mxu0 %v1920_v6 }
 0x498   :  { %716 = vmatprep.subr.mxu0 %v1929_v8 }
 0x499   :  { %717 = vmatpush1.msra.mxu0 %v1941_v11 }
 0x49a   :  { %718 = vmatprep.subr.mxu0 %v1947_v12 }
 0x49b   :  { %719 = vmatpush1.msra.mxu0 %v1954_v13 }
 0x49c   :  { %720 = vmatprep.subr.mxu0 %v1961_v14 }
 0x49d   :  { %721 = vmatpush1.msra.mxu0 %v1968_v15 }
 0x49e   :  { %722 = vmatprep.subr.mxu0 %v1975_v16 }
 0x49f   :  { %723 = vmatpush1.msra.mxu0 %v1982_v17 }
 0x4a0   :  { %724 = vmatprep.subr.mxu0 %v1989_v18 }
 0x4a1   :  { %725 = vmatpush1.msra.mxu0 %v1996_v19 }
 0x4a2   :  { %928 = vmatprep.subr.mxu0 %v1886_v0 }
 0x552   :  { %v542_v55 = vpop.f32.mrf.mxu0 }
 0x553   :  { %v547_v57 = vadd.f32 %v542_v55, %v180_v54 }
 0x554   :  { %v544_v58 = vpop.f32.mrf.mxu0 }
 0x555   :  { %v548_v59 = vadd.f32 %v544_v58, %v182_v56  ;;  %v1584_v61 = vmul.f32 -1.442695, %v547_v57 }
 0x557   :  { %1733 = vtanh.f32 %v548_v59  ;;  %v1585_v24 = vmul.f32 -1.442695, %v548_v59 }
 0x558   :  { %1735 = vpow2.f32 %v1584_v61 }
 0x564   :  { %v1734_v60 = vpop.eup %1733 }
 0x565   :  { %564 = vrot.lane.b32.xlu1 %v1734_v60, %s1806_s19  ;;  %v1736_v62 = vpop.eup %1735 }
 0x566   :  { %v555_v63 = vadd.f32 1.0, %v1736_v62  ;;  %v192_v62 = vadd.f32 %v2125_v46, %v2035_v25 }
 0x568   :  { %1737 = vrcp.f32 %v555_v63 }
 0x575   :  { %v1738_v7 = vpop.eup %1737 }
 0x576   :  { %v562_v20 = vmul.f32 %v1738_v7, %v463_v34  ;;  %v188_v34 = vadd.f32 %v187_v45, %v2038_v29 }
 0x5d7   :  { %v565_v9 = vpop.permute.xlu1 %564 }
 0x5d8   :  { %v567_v10 = vmul.f32 %v1738_v7, %v565_v9  ;;  %v194_v7 = vadd.f32 %v2127_v47, %v2038_v29 }
 0x5da   :  { %569 = vrot.lane.b32.xlu0 %v567_v10, %s1806_s19 }
 0x64c   :  { %v570_v21 = vpop.permute.xlu0 %569 }
 0x64d   :  { %v572_v22 = vadd.f32 %v570_v21, %v562_v20 }
 0x64f   :  { %1739 = vtanh.f32 %v572_v22 }
 0x650   :  { %1741 = vpow2.f32 %v1585_v24 }
 0x65c   :  { %v1740_v23 = vpop.eup %1739 }
 0x65d   :  { %575 = vrot.lane.b32.xlu1 %v1740_v23, %s1806_s19  ;;  %v1742_v26 = vpop.eup %1741 }
 0x65e   :  { %v556_v27 = vadd.f32 1.0, %v1742_v26 }
 0x660   :  { %1743 = vrcp.f32 %v556_v27 }
 0x66d   :  { %v1744_v28 = vpop.eup %1743 }
 0x6cf   :  { %v576_v30 = vpop.permute.xlu1 %575 }
 0x6d0   :  { %v578_v31 = vmul.f32 %v1744_v28, %v576_v30 }
 0x6d2   :  { %1586 = vmatmul.mubr.msk.f32.vlgmr.msra.gmra.mxu1 %vm51_vm0, %v578_v31 }
 0x6d3   :  { %820 = vmatpush1.msra.mxu1 %v1891_v1  ;;  %867 = vmatprep.mubr.f32.mxu1 %v1805_v3 }
 0x6d4   :  { %821 = vmatprep.subr.mxu1 %v1896_v2 }
 0x6d5   :  { %822 = vmatpush1.msra.mxu1 %v1908_v4 }
 0x6d6   :  { %823 = vmatprep.subr.mxu1 %v1914_v5 }
 0x6d7   :  { %824 = vmatpush1.msra.mxu1 %v1920_v6 }
 0x6d8   :  { %825 = vmatprep.subr.mxu1 %v1929_v8 }
 0x6d9   :  { %826 = vmatpush1.msra.mxu1 %v1941_v11 }
 0x6da   :  { %827 = vmatprep.subr.mxu1 %v1947_v12 }
 0x6db   :  { %828 = vmatpush1.msra.mxu1 %v1954_v13 }
 0x6dc   :  { %829 = vmatprep.subr.mxu1 %v1961_v14 }
 0x6dd   :  { %830 = vmatpush1.msra.mxu1 %v1968_v15 }
 0x6de   :  { %831 = vmatprep.subr.mxu1 %v1975_v16 }
 0x6df   :  { %832 = vmatpush1.msra.mxu1 %v1982_v17 }
 0x6e0   :  { %833 = vmatprep.subr.mxu1 %v1989_v18 }
 0x6e1   :  { %834 = vmatpush1.msra.mxu1 %v1996_v19 }
 0x6e2   :  { %1037 = vmatprep.subr.mxu1 %v1886_v0 }
 0x792   :  { %v651_v33 = vpop.f32.mrf.mxu1 }
 0x793   :  { %v656_v35 = vadd.f32 %v651_v33, %v186_v32 }
 0x794   :  { %v653_v36 = vpop.f32.mrf.mxu1 }
 0x795   :  { %v657_v37 = vadd.f32 %v653_v36, %v188_v34  ;;  %v1587_v39 = vmul.f32 -1.442695, %v656_v35 }
 0x797   :  { %1745 = vtanh.f32 %v657_v37  ;;  %v1588_v56 = vmul.f32 -1.442695, %v657_v37 }
 0x798   :  { %1747 = vpow2.f32 %v1587_v39 }
 0x7a4   :  { %v1746_v38 = vpop.eup %1745 }
 0x7a5   :  { %673 = vrot.lane.b32.xlu0 %v1746_v38, %s1806_s19  ;;  %v1748_v40 = vpop.eup %1747 }
 0x7a6   :  { %v664_v41 = vadd.f32 1.0, %v1748_v40 }
 0x7a8   :  { %1749 = vrcp.f32 %v664_v41 }
 0x7b5   :  { %v1750_v42 = vpop.eup %1749 }
 0x7b6   :  { %v671_v44 = vmul.f32 %v1750_v42, %v572_v22 }
 0x817   :  { %v674_v43 = vpop.permute.xlu0 %673 }
 0x818   :  { %v676_v0 = vmul.f32 %v1750_v42, %v674_v43 }
 0x81a   :  { %678 = vrot.lane.b32.xlu1 %v676_v0, %s1806_s19  ;;  %v204_v0 = vadd.f32 %v2133_v50, %v2035_v25 }
 0x88c   :  { %v679_v54 = vpop.permute.xlu1 %678 }
 0x88d   :  { %v681_v45 = vadd.f32 %v679_v54, %v671_v44  ;;  %v206_v54 = vadd.f32 %v2135_v51, %v2038_v29 }
 0x88f   :  { %1751 = vtanh.f32 %v681_v45 }
 0x890   :  { %1753 = vpow2.f32 %v1588_v56 }
 0x89c   :  { %v1752_v55 = vpop.eup %1751 }
 0x89d   :  { %684 = vrot.lane.b32.xlu0 %v1752_v55, %s1806_s19  ;;  %v1754_v57 = vpop.eup %1753 }
 0x89e   :  { %v665_v58 = vadd.f32 1.0, %v1754_v57 }
 0x8a0   :  { %1755 = vrcp.f32 %v665_v58 }
 0x8ad   :  { %v1756_v59 = vpop.eup %1755 }
 0x90f   :  { %v685_v60 = vpop.permute.xlu0 %684 }
 0x910   :  { %v687_v61 = vmul.f32 %v1756_v59, %v685_v60 }
 0x912   :  { %1589 = vmatmul.mubr.msk.f32.vlgmr.msra.gmra.mxu0 %vm51_vm0, %v687_v61 }
 0x913   :  { %929 = vmatpush1.msra.mxu0 %v1891_v1  ;;  %976 = vmatprep.mubr.f32.mxu0 %v1805_v3 }
 0x914   :  { %930 = vmatprep.subr.mxu0 %v1896_v2 }
 0x915   :  { %931 = vmatpush1.msra.mxu0 %v1908_v4 }
 0x916   :  { %932 = vmatprep.subr.mxu0 %v1914_v5 }
 0x917   :  { %933 = vmatpush1.msra.mxu0 %v1920_v6 }
 0x918   :  { %934 = vmatprep.subr.mxu0 %v1929_v8 }
 0x919   :  { %935 = vmatpush1.msra.mxu0 %v1941_v11 }
 0x91a   :  { %936 = vmatprep.subr.mxu0 %v1947_v12 }
 0x91b   :  { %937 = vmatpush1.msra.mxu0 %v1954_v13 }
 0x91c   :  { %938 = vmatprep.subr.mxu0 %v1961_v14 }
 0x91d   :  { %939 = vmatpush1.msra.mxu0 %v1968_v15 }
 0x91e   :  { %940 = vmatprep.subr.mxu0 %v1975_v16 }
 0x91f   :  { %941 = vmatpush1.msra.mxu0 %v1982_v17 }
 0x920   :  { %942 = vmatprep.subr.mxu0 %v1989_v18 }
 0x921   :  { %943 = vmatpush1.msra.mxu0 %v1996_v19 }
 0x922   :  { %1641 = vmatprep.subr.mxu0 %v1805_v3 }
 0x9d2   :  { %v760_v63 = vpop.f32.mrf.mxu0 }
 0x9d3   :  { %v765_v9 = vadd.f32 %v760_v63, %v192_v62 }
 0x9d4   :  { %v762_v10 = vpop.f32.mrf.mxu0 }
 0x9d5   :  { %v766_v20 = vadd.f32 %v762_v10, %v194_v7  ;;  %v1590_v22 = vmul.f32 -1.442695, %v765_v9 }
 0x9d7   :  { %1757 = vtanh.f32 %v766_v20  ;;  %v1591_v32 = vmul.f32 -1.442695, %v766_v20 }
 0x9d8   :  { %1759 = vpow2.f32 %v1590_v22 }
 0x9e4   :  { %v1758_v21 = vpop.eup %1757 }
 0x9e5   :  { %782 = vrot.lane.b32.xlu1 %v1758_v21, %s1806_s19  ;;  %v1760_v23 = vpop.eup %1759 }
 0x9e6   :  { %v773_v24 = vadd.f32 1.0, %v1760_v23 }
 0x9e8   :  { %1761 = vrcp.f32 %v773_v24 }
 0x9f5   :  { %v1762_v26 = vpop.eup %1761 }
 0x9f6   :  { %v780_v46 = vmul.f32 %v1762_v26, %v681_v45 }
 0xa57   :  { %v783_v27 = vpop.permute.xlu1 %782 }
 0xa58   :  { %v785_v28 = vmul.f32 %v1762_v26, %v783_v27  ;;  %v210_v26 = vadd.f32 %v2137_v52, %v2035_v25 }
 0xa5a   :  { %787 = vrot.lane.b32.xlu0 %v785_v28, %s1806_s19  ;;  %v212_v28 = vadd.f32 %v2139_v53, %v2038_v29 }
 0xacc   :  { %v788_v30 = vpop.permute.xlu0 %787 }
 0xacd   :  { %v790_v47 = vadd.f32 %v788_v30, %v780_v46 }
 0xacf   :  { %1763 = vtanh.f32 %v790_v47 }
 0xad0   :  { %1765 = vpow2.f32 %v1591_v32 }
 0xadc   :  { %v1764_v31 = vpop.eup %1763 }
 0xadd   :  { %793 = vrot.lane.b32.xlu1 %v1764_v31, %s1806_s19  ;;  %v1766_v33 = vpop.eup %1765  ;;  %v1224_v31 = vld [vmem:[%s2373_s7] sm:$0x3f] }
 0xade   :  { %v774_v34 = vadd.f32 1.0, %v1766_v33 }
 0xae0   :  { %1767 = vrcp.f32 %v774_v34 }
 0xaed   :  { %v1768_v35 = vpop.eup %1767 }
 0xb4f   :  { %v794_v36 = vpop.permute.xlu1 %793 }
 0xb50   :  { %v796_v37 = vmul.f32 %v1768_v35, %v794_v36  ;;  %v1141_v36 = vld [vmem:[%s2375_s5 + $0x38] sm:$0xff] }
 0xb52   :  { %1592 = vmatmul.mubr.msk.f32.vlgmr.msra.gmra.mxu1 %vm51_vm0, %v796_v37  ;;  %v1140_v37 = vld [vmem:[%s2375_s5 + $0x30] sm:$0xff] }
 0xb53   :  { %1038 = vmatpush1.msra.mxu1 %v1891_v1  ;;  %1085 = vmatprep.mubr.f32.mxu1 %v1805_v3  ;;  %v198_v1 = vadd.f32 %v2129_v48, %v2035_v25  ;;  %v1223_v25 = vld [vmem:[%s2374_s1] sm:$0xff] }
 0xb54   :  { %1039 = vmatprep.subr.mxu1 %v1896_v2 }
 0xb55   :  { %1040 = vmatpush1.msra.mxu1 %v1908_v4  ;;  %v200_v4 = vadd.f32 %v2131_v49, %v2038_v29 }
 0xb56   :  { %1041 = vmatprep.subr.mxu1 %v1914_v5 }
 0xb57   :  { %1042 = vmatpush1.msra.mxu1 %v1920_v6 }
 0xb58   :  { %1043 = vmatprep.subr.mxu1 %v1929_v8 }
 0xb59   :  { %1044 = vmatpush1.msra.mxu1 %v1941_v11 }
 0xb5a   :  { %1045 = vmatprep.subr.mxu1 %v1947_v12 }
 0xb5b   :  { %1046 = vmatpush1.msra.mxu1 %v1954_v13 }
 0xb5c   :  { %1047 = vmatprep.subr.mxu1 %v1961_v14 }
 0xb5d   :  { %1048 = vmatpush1.msra.mxu1 %v1968_v15 }
 0xb5e   :  { %1049 = vmatprep.subr.mxu1 %v1975_v16 }
 0xb5f   :  { %1050 = vmatpush1.msra.mxu1 %v1982_v17 }
 0xb60   :  { %1051 = vmatprep.subr.mxu1 %v1989_v18 }
 0xb61   :  { %1052 = vmatpush1.msra.mxu1 %v1996_v19 }
 0xb62   :  { %1660 = vmatprep.subr.mxu1 %v1805_v3 }
 0xc12   :  { %v869_v2 = vpop.f32.mrf.mxu1 }
 0xc13   :  { %v874_v5 = vadd.f32 %v869_v2, %v198_v1  ;;  %v1139_v1 = vld [vmem:[%s2375_s5 + $0x28] sm:$0xff] }
 0xc14   :  { %v871_v6 = vpop.f32.mrf.mxu1 }
 0xc15   :  { %v875_v8 = vadd.f32 %v871_v6, %v200_v4  ;;  %v1593_v12 = vmul.f32 -1.442695, %v874_v5  ;;  %v1138_v6 = vld [vmem:[%s2375_s5 + $0x20] sm:$0xff] }
 0xc17   :  { %1769 = vtanh.f32 %v875_v8  ;;  %v1594_v38 = vmul.f32 -1.442695, %v875_v8  ;;  %v1137_v8 = vld [vmem:[%s2375_s5 + $0x18] sm:$0xff] }
 0xc18   :  { %1771 = vpow2.f32 %v1593_v12  ;;  %v1135_v12 = vld [vmem:[%s2375_s5 + $0x8] sm:$0xff] }
 0xc24   :  { %v1770_v11 = vpop.eup %1769 }
 0xc25   :  { %891 = vrot.lane.b32.xlu0 %v1770_v11, %s1806_s19  ;;  %v1772_v13 = vpop.eup %1771  ;;  %v1136_v11 = vld [vmem:[%s2375_s5 + $0x10] sm:$0xff] }
 0xc26   :  { %v882_v14 = vadd.f32 1.0, %v1772_v13  ;;  %v1134_v13 = vld [vmem:[%s2375_s5] sm:$0xff] }
 0xc28   :  { %1773 = vrcp.f32 %v882_v14 }
 0xc35   :  { %v1774_v15 = vpop.eup %1773 }
 0xc36   :  { %v889_v18 = vmul.f32 %v1774_v15, %v790_v47 }
 0xc97   :  { %v892_v16 = vpop.permute.xlu0 %891 }
 0xc98   :  { %v894_v17 = vmul.f32 %v1774_v15, %v892_v16 }
 0xc9a   :  { %896 = vrot.lane.b32.xlu1 %v894_v17, %s1806_s19 }
 0xd0c   :  { %v897_v19 = vpop.permute.xlu1 %896 }
 0xd0d   :  { %v899_v48 = vadd.f32 %v897_v19, %v889_v18 }
 0xd0f   :  { %1775 = vtanh.f32 %v899_v48 }
 0xd10   :  { %1777 = vpow2.f32 %v1594_v38 }
 0xd1c   :  { %v1776_v49 = vpop.eup %1775 }
 0xd1d   :  { %902 = vrot.lane.b32.xlu0 %v1776_v49, %s1806_s19  ;;  %v1778_v39 = vpop.eup %1777 }
 0xd1e   :  { %v883_v40 = vadd.f32 1.0, %v1778_v39 }
 0xd20   :  { %1779 = vrcp.f32 %v883_v40  ;;  %v1318_v40 = vld [vmem:[%s2376_s9 + $0x38] sm:$0xff] }
 0xd2d   :  { %v1780_v41 = vpop.eup %1779 }
 0xd8f   :  { %v903_v42 = vpop.permute.xlu0 %902 }
 0xd90   :  { %v905_v43 = vmul.f32 %v1780_v41, %v903_v42  ;;  %v1317_v42 = vld [vmem:[%s2376_s9 + $0x30] sm:$0xff] }
 0xd92   :  { %1595 = vmatmul.mubr.msk.f32.vlgmr.msra.gmra.mxu0 %vm51_vm0, %v905_v43  ;;  %v1316_v43 = vld [vmem:[%s2376_s9 + $0x28] sm:$0xff] }
 0xd93   :  { %1657 = vmatprep.mubr.msk.f32.mxu0 %vm1807_vm4, %v1805_v3  ;;  %1642 = vmatpush3.msra.mxu0 %v1141_v36 }
 0xd94   :  { %1643 = vmatprep.subr.mxu0 %v1805_v3 }
 0xd95   :  { %1644 = vmatpush3.msra.mxu0 %v1140_v37 }
 0xd96   :  { %1645 = vmatprep.subr.mxu0 %v1805_v3 }
 0xd97   :  { %1646 = vmatpush3.msra.mxu0 %v1139_v1 }
 0xd98   :  { %1647 = vmatprep.subr.mxu0 %v1805_v3 }
 0xd99   :  { %1648 = vmatpush3.msra.mxu0 %v1138_v6 }
 0xd9a   :  { %1649 = vmatprep.subr.mxu0 %v1805_v3 }
 0xd9b   :  { %1650 = vmatpush3.msra.mxu0 %v1137_v8 }
 0xd9c   :  { %1651 = vmatprep.subr.mxu0 %v1805_v3 }
 0xd9d   :  { %1652 = vmatpush3.msra.mxu0 %v1136_v11 }
 0xd9e   :  { %1653 = vmatprep.subr.mxu0 %v1805_v3 }
 0xd9f   :  { %1654 = vmatpush3.msra.mxu0 %v1135_v12 }
 0xda0   :  { %1655 = vmatprep.subr.mxu0 %v1805_v3 }
 0xda1   :  { %1656 = vmatpush3.msra.mxu0 %v1134_v13 }
 0xda2   :  { %1665 = vmatprep.subr.mxu0 %v1805_v3 }
 0xe52   :  { %v978_v44 = vpop.f32.mrf.mxu0 }
 0xe53   :  { %v983_v45 = vadd.f32 %v978_v44, %v204_v0  ;;  %v1315_v0 = vld [vmem:[%s2376_s9 + $0x20] sm:$0xff] }
 0xe54   :  { %v980_v55 = vpop.f32.mrf.mxu0  ;;  %v1603_v44 = vld [vmem:[%s2377_s8] ss:$0 sm:$0xff] }
 0xe55   :  { %v984_v56 = vadd.f32 %v980_v55, %v206_v54  ;;  %v1596_v58 = vmul.f32 -1.442695, %v983_v45  ;;  %v1314_v54 = vld [vmem:[%s2376_s9 + $0x18] sm:$0xff]  ;;  %v1313_v55 = vld [vmem:[%s2376_s9 + $0x10] sm:$0xff] }
 0xe57   :  { %1781 = vtanh.f32 %v984_v56  ;;  %v1597_v10 = vmul.f32 -1.442695, %v984_v56  ;;  %v1312_v56 = vld [vmem:[%s2376_s9 + $0x8] sm:$0xff] }
 0xe58   :  { %1783 = vpow2.f32 %v1596_v58  ;;  %v1311_v58 = vld [vmem:[%s2376_s9] sm:$0xff] }
 0xe64   :  { %v1782_v57 = vpop.eup %1781 }
 0xe65   :  { %1000 = vrot.lane.b32.xlu1 %v1782_v57, %s1806_s19  ;;  %v1784_v59 = vpop.eup %1783 }
 0xe66   :  { %v991_v60 = vadd.f32 1.0, %v1784_v59  ;;  %v1407_v59 = vld [vmem:[%s2378_s12 + $0x18] sm:$0xff] }
 0xe68   :  { %1785 = vrcp.f32 %v991_v60  ;;  %v1406_v60 = vld [vmem:[%s2378_s12 + $0x10] sm:$0xff] }
 0xe75   :  { %v1786_v61 = vpop.eup %1785 }
 0xe76   :  { %v998_v50 = vmul.f32 %v1786_v61, %v899_v48 }
 0xed7   :  { %v1001_v62 = vpop.permute.xlu1 %1000 }
 0xed8   :  { %v1003_v63 = vmul.f32 %v1786_v61, %v1001_v62  ;;  %v1405_v61 = vld [vmem:[%s2378_s12 + $0x8] sm:$0xff]  ;;  %v1404_v62 = vld [vmem:[%s2378_s12] sm:$0xff] }
 0xeda   :  { %1005 = vrot.lane.b32.xlu0 %v1003_v63, %s1806_s19 }
 0xf4c   :  { %v1006_v7 = vpop.permute.xlu0 %1005 }
 0xf4d   :  { %v1008_v51 = vadd.f32 %v1006_v7, %v998_v50  ;;  %v1606_v7 = vld [vmem:[%s2379_s10] ss:$0 sm:$0xff] }
 0xf4f   :  { %1787 = vtanh.f32 %v1008_v51 }
 0xf50   :  { %1789 = vpow2.f32 %v1597_v10 }
 0xf5c   :  { %v1788_v9 = vpop.eup %1787 }
 0xf5d   :  { %1011 = vrot.lane.b32.xlu1 %v1788_v9, %s1806_s19  ;;  %v1790_v20 = vpop.eup %1789 }
 0xf5e   :  { %v992_v21 = vadd.f32 1.0, %v1790_v20 }
 0xf60   :  { %1791 = vrcp.f32 %v992_v21  ;;  %v1403_v21 = vld [vmem:[%s2380_s11 + $0x18] sm:$0xff] }
 0xf6d   :  { %v1792_v22 = vpop.eup %1791 }
 0xfcf   :  { %v1012_v23 = vpop.permute.xlu1 %1011 }
 0xfd0   :  { %v1014_v24 = vmul.f32 %v1792_v22, %v1012_v23  ;;  %v1601_v22 = vld [vmem:[%s2381_s6] ss:$0 sm:$0xff]  ;;  %v1402_v23 = vld [vmem:[%s2380_s11 + $0x10] sm:$0xff] }
 0xfd2   :  { %1598 = vmatmul.mubr.msk.f32.vlgmr.msra.gmra.mxu1 %vm51_vm0, %v1014_v24 }
 0xfd3   :  { %1662 = vmatprep.mubr.msk.f32.mxu1 %vm1807_vm4, %v1805_v3  ;;  %1661 = vmatpush3.msk.msra.mxu1 %vm1236_vm2, %v1224_v31  ;;  %v1610_v31 = vld [vmem:[%s2382_s13] ss:$0 sm:$0xff] }
 0xfd4   :  { %1684 = vmatprep.subr.mxu1 %v1805_v3 }
 0xfd6   :  { %1663 = vmatmul.mubr.msk.f32.vlgmr.msra.gmra.mxu1 %vm1232_vm3, %v1223_v25 }
 0xfd7   :  { %1692 = vmatprep.mubr.msk.f32.mxu1 %vm1807_vm4, %v1805_v3  ;;  %1685 = vmatpush3.msra.mxu1 %v1407_v59 }
 0xfd8   :  { %1686 = vmatprep.subr.mxu1 %v1805_v3 }
 0xfd9   :  { %1687 = vmatpush3.msra.mxu1 %v1406_v60 }
 0xfda   :  { %1688 = vmatprep.subr.mxu1 %v1805_v3 }
 0xfdb   :  { %1689 = vmatpush3.msra.mxu1 %v1405_v61 }
 0xfdc   :  { %1690 = vmatprep.subr.mxu1 %v1805_v3 }
 0xfdd   :  { %1691 = vmatpush3.msra.mxu1 %v1404_v62 }
 0xfde   :  { %1695 = vmatprep.subr.mxu1 %v1805_v3 }
0x1092   :  { %v1087_v27 = vpop.f32.mrf.mxu1 }
0x1093   :  { %v1092_v46 = vadd.f32 %v1087_v27, %v210_v26  ;;  %v1401_v26 = vld [vmem:[%s2380_s11 + $0x8] sm:$0xff]  ;;  %v1400_v27 = vld [vmem:[%s2380_s11] sm:$0xff] }
0x1094   :  { %v1089_v30 = vpop.f32.mrf.mxu1 }
0x1095   :  { %v1093_v47 = vadd.f32 %v1089_v30, %v212_v28  ;;  %v1599_v52 = vmul.f32 -1.442695, %v1092_v46 }
0x1096   :  { %v1306_v15 = vpop.f32.mrf.mxu1 }
0x1097   :  { %1793 = vtanh.f32 %v1093_v47  ;;  %v1600_v17 = vmul.f32 -1.442695, %v1093_v47  ;;  %v1307_v45 = vadd.f32 %v1603_v44, %v1306_v15 }
0x1098   :  { %1795 = vpow2.f32 %v1599_v52  ;;  %v1664_v16 = vpop.f32.mrf.mxu1 }
0x1099   :  { %v1310_v57 = vmax.f32 %v1307_v45, 0.0 }
0x10a4   :  { %v1794_v29 = vpop.eup %1793 }
0x10a5   :  { %1109 = vrot.lane.b32.xlu0 %v1794_v29, %s1806_s19  ;;  %v1796_v53 = vpop.eup %1795 }
0x10a6   :  { %v1100_v32 = vadd.f32 1.0, %v1796_v53 }
0x10a8   :  { %1797 = vrcp.f32 %v1100_v32 }
0x10b5   :  { %v1798_v33 = vpop.eup %1797 }
0x10b6   :  { %v1107_v2 = vmul.f32 %v1798_v33, %v1008_v51 }
0x1117   :  { %v1110_v34 = vpop.permute.xlu0 %1109 }
0x1118   :  { %v1112_v35 = vmul.f32 %v1798_v33, %v1110_v34 }
0x111a   :  { %1114 = vrot.lane.b32.xlu1 %v1112_v35, %s1806_s19 }
0x118c   :  { %v1115_v4 = vpop.permute.xlu1 %1114 }
0x118d   :  { %v1117_v5 = vadd.f32 %v1115_v4, %v1107_v2 }
0x118f   :  { %1799 = vtanh.f32 %v1117_v5  ;;  %1126 = vrot.lane.b32.xlu1 %v1117_v5, %s1806_s19 }
0x1190   :  { %1801 = vpow2.f32 %v1600_v17 }
0x119c   :  { %v1800_v14 = vpop.eup %1799 }
0x119d   :  { %1120 = vrot.lane.b32.xlu0 %v1800_v14, %s1806_s19  ;;  %v1802_v18 = vpop.eup %1801 }
0x119e   :  { %v1101_v19 = vadd.f32 1.0, %v1802_v18 }
0x11a0   :  { %1803 = vrcp.f32 %v1101_v19 }
0x11ad   :  { %v1804_v49 = vpop.eup %1803 }
0x1201   :  { %v1127_v48 = vpop.permute.xlu1 %1126 }
0x1202   :  { %1129 = vst.msk [vmem:[#allocation4] sm:$0xff] %vm51_vm0, %v1127_v48 }
0x120f   :  { %v1121_v38 = vpop.permute.xlu0 %1120 }
0x1210   :  { %v1123_v39 = vmul.f32 %v1804_v49, %v1121_v38 }
0x1212   :  { %1124 = vst.msk [vmem:[#allocation3] sm:$0xff] %vm51_vm0, %v1123_v39 }
0x1219   :  { %v1133_v41 = vld [vmem:[#allocation3] sm:$0xff] }
0x121a   :  { %1658 = vmatmul.mubr.msk.f32.vlgmr.msra.gmra.mxu0 %vm51_vm0, %v1133_v41 }
0x121b   :  { %1666 = vmatpush3.msra.mxu0 %v1318_v40  ;;  %1681 = vmatprep.mubr.msk.f32.mxu0 %vm1807_vm4, %v1805_v3 }
0x121c   :  { %1667 = vmatprep.subr.mxu0 %v1805_v3 }
0x121d   :  { %1668 = vmatpush3.msra.mxu0 %v1317_v42 }
0x121e   :  { %1669 = vmatprep.subr.mxu0 %v1805_v3 }
0x121f   :  { %1670 = vmatpush3.msra.mxu0 %v1316_v43 }
0x1220   :  { %1671 = vmatprep.subr.mxu0 %v1805_v3 }
0x1221   :  { %1672 = vmatpush3.msra.mxu0 %v1315_v0 }
0x1222   :  { %1673 = vmatprep.subr.mxu0 %v1805_v3 }
0x1223   :  { %1674 = vmatpush3.msra.mxu0 %v1314_v54 }
0x1224   :  { %1675 = vmatprep.subr.mxu0 %v1805_v3 }
0x1225   :  { %1676 = vmatpush3.msra.mxu0 %v1313_v55 }
0x1226   :  { %1677 = vmatprep.subr.mxu0 %v1805_v3 }
0x1227   :  { %1678 = vmatpush3.msra.mxu0 %v1312_v56 }
0x1228   :  { %1679 = vmatprep.subr.mxu0 %v1805_v3 }
0x1229   :  { %1680 = vmatpush3.msra.mxu0 %v1311_v58 }
0x122a   :  { %1682 = vmatmul.mubr.msk.f32.vlgmr.msra.gmra.mxu0 %vm51_vm0, %v1310_v57 }
0x12da   :  { %v1218_v63 = vpop.f32.mrf.mxu0 }
0x12db   :  { %v1219_v24 = vadd.f32 %v1601_v22, %v1218_v63 }
0x12dc   :  { %v1659_v50 = vpop.f32.mrf.mxu0 }
0x12dd   :  { %v1222_v28 = vmax.f32 %v1219_v24, 0.0 }
0x12ea   :  { %v1395_v51 = vpop.f32.mrf.mxu0 }
0x12eb   :  { %v1396_v9 = vadd.f32 %v1606_v7, %v1395_v51 }
0x12ec   :  { %v1683_v10 = vpop.f32.mrf.mxu0 }
0x12ed   :  { %v1399_v20 = vmax.f32 %v1396_v9, 0.0 }
0x12ef   :  { %1693 = vmatmul.mubr.msk.f32.vlgmr.msra.gmra.mxu1 %vm1408_vm5, %v1399_v20 }
0x12f0   :  { %1696 = vmatpush3.msra.mxu1 %v1403_v21  ;;  %1703 = vmatprep.mubr.msk.f32.mxu1 %vm1807_vm4, %v1805_v3 }
0x12f1   :  { %1697 = vmatprep.subr.mxu1 %v1805_v3 }
0x12f2   :  { %1698 = vmatpush3.msra.mxu1 %v1402_v23 }
0x12f3   :  { %1699 = vmatprep.subr.mxu1 %v1805_v3 }
0x12f4   :  { %1700 = vmatpush3.msra.mxu1 %v1401_v26 }
0x12f5   :  { %1701 = vmatprep.subr.mxu1 %v1805_v3 }
0x12f6   :  { %1702 = vmatpush3.msra.mxu1 %v1400_v27 }
0x12f7   :  { %1704 = vmatmul.mubr.msk.f32.vlgmr.msra.gmra.mxu1 %vm1408_vm5, %v1222_v28 }
0x13af   :  { %v1478_v46 = vpop.f32.mrf.mxu1 }
0x13b1   :  { %v1694_v30 = vpop.f32.mrf.mxu1 }
0x13b7   :  { %v1551_v47 = vpop.f32.mrf.mxu1 }
0x13b8   :  { %v1552_v25 = vadd.f32 %v1551_v47, %v1478_v46 }
0x13b9   :  { %v1705_v29 = vpop.f32.mrf.mxu1 }
0x13ba   :  { %v1562_v52 = vadd.f32 %v1610_v31, %v1552_v25 }
0x13bc   :  { %v1563_v53 = vmax.f32 %v1562_v52, 0.0 }
0x13be   :  { %1564 = vst.msk [vmem:[%s2383_s14] sm:$0xff] %vm1408_vm5, %v1563_v53 }

</bundles_post_ra>
